<compile_context>
chip_gen: v5e
topology: v5e:2x2
jax: 0.10.0
libtpu: 0.0.40
codegen_flags: <defaults>
</compile_context>

<pallas_src>
import functools

import jax
import jax.numpy as jnp
from jax import lax
from jax.experimental import pallas as pl
from jax.experimental.pallas import tpu as pltpu


def _round_up(x, m):
    return ((x + m - 1) // m) * m


def _vmem_limit_bytes():
    """~3/4 of physical VMEM, capped at 100 MiB.
    v5e/v6e (128 MiB) -> ~96 MiB, v7x (64 MiB) -> 48 MiB, fallback 48 MiB."""
    cap = 64 * 1024 * 1024
    try:
        info = pltpu.get_tpu_info()
        cap = int(getattr(info, "vmem_capacity_bytes", cap))
    except Exception:
        pass
    return max(32 * 1024 * 1024, min(cap * 3 // 4, 100 * 1024 * 1024))


# ---------------------------------------------------------------------------
# Kernel 1: router (switch linear + softmax).  Padded expert columns carry a
# -1e30 bias so the softmax over the padded width equals the real softmax.
# Emits pmax / argmax-index / per-tile partial prob-sum instead of full probs.
# ---------------------------------------------------------------------------
def _router_kernel(x_ref, w_ref, b_ref, pmax_ref, idx_ref, psum_ref,
                   *, n_tokens, n_pad_experts):
    tm = x_ref.shape[0]
    logits = jnp.dot(x_ref[...], w_ref[...],
                     preferred_element_type=jnp.float32) + b_ref[...]
    m = jnp.max(logits, axis=-1, keepdims=True)
    e = jnp.exp(logits - m)
    denom = jnp.sum(e, axis=-1, keepdims=True)
    p = e * pl.reciprocal(denom, approx=True)          # divide on EUP slot

    # Row max probability and first-occurrence argmax (via iota + min).
    pmax_ref[...] = jnp.max(p, axis=-1, keepdims=True)
    col = lax.broadcasted_iota(jnp.int32, logits.shape, 1)
    idx_ref[...] = jnp.min(jnp.where(logits == m, col, n_pad_experts),
                           axis=-1, keepdims=True).astype(jnp.int32)

    # Per-tile partial sum of probabilities over valid (non-padded) tokens.
    row = lax.broadcasted_iota(jnp.int32, p.shape, 0) + pl.program_id(0) * tm
    p_valid = jnp.where(row < n_tokens, p, 0.0)
    psum_ref[...] = jnp.broadcast_to(
        jnp.sum(p_valid, axis=0, keepdims=True), psum_ref.shape)


# ---------------------------------------------------------------------------
# Kernel 2: grouped expert MLP.  Grid = (token_tiles, expert_depth).
# One (dp, dp) bf16 weight slab resident per step; running activation held in
# f32 VMEM scratch; fully-padded tiles skipped; pmax scale fused at the end.
# ---------------------------------------------------------------------------
def _expert_mlp_kernel(te_ref, tv_ref, x_ref, w_ref, b_ref, pm_ref, o_ref,
                       h_ref, *, num_layers, scale_by_prob):
    del te_ref  # consumed only by the index_maps
    i = pl.program_id(0)
    l = pl.program_id(1)

    @pl.when(tv_ref[i] > 0)                 # skip fully-padded tiles
    def _():
        @pl.when(l == 0)
        def _():
            h_ref[...] = x_ref[...].astype(jnp.float32)

        acc = jnp.dot(h_ref[...].astype(jnp.bfloat16), w_ref[0, 0],
                      preferred_element_type=jnp.float32) + b_ref[0, 0]

        @pl.when(l < num_layers - 1)
        def _():
            h_ref[...] = acc                 # carry activation in f32

        @pl.when(l == num_layers - 1)
        def _():
            out = acc * pm_ref[...] if scale_by_prob else acc
            o_ref[...] = out.astype(o_ref.dtype)


# ---------------------------------------------------------------------------
# Parameter prep (run ONCE, outside the jitted step): lane/feature padding and
# bf16 cast of expert weights so the forward does no per-call weight copies.
# ---------------------------------------------------------------------------
def prepare_params(w_switch, b_switch, w_experts, b_experts):
    d, E = w_switch.shape
    _, L, _, _ = w_experts.shape
    dp = _round_up(d, 128)
    Ep = _round_up(E, 128)
    f32 = jnp.float32

    if d == dp and E == Ep:
        w_sw = w_switch
    else:
        w_sw = jnp.zeros((dp, Ep), w_switch.dtype).at[:d, :E].set(w_switch)
    b_sw = jnp.full((1, Ep), -1e30, f32).at[0, :E].set(b_switch.astype(f32))

    # Expert weights pre-cast to bf16 (MXU operand dtype); biases stay f32.
    w_e = jnp.zeros((E, L, dp, dp), jnp.bfloat16).at[:, :, :d, :d].set(
        w_experts.astype(jnp.bfloat16))
    b_e = jnp.zeros((E, L, 1, dp), f32).at[:, :, 0, :d].set(
        b_experts.astype(f32))
    return w_sw, b_sw, w_e, b_e


def experts_forward(x, w_sw, b_sw, w_e, b_e, *, is_scale_prob=True, tm=256):
    """x: (seq_len, batch, d_model).  Returns (output, counts, route_prob_sum,
    n_dropped, route_prob_max) matching the PyTorch module (drop_tokens=False).
    Pass parameters produced by prepare_params()."""
    seq_len, batch, d = x.shape
    E, L, dp, _ = w_e.shape
    Ep = w_sw.shape[1]
    T = seq_len * batch
    assert tm % 8 == 0
    Tp = _round_up(T, tm)
    f32 = jnp.float32
    vmem = _vmem_limit_bytes()

    x2 = x.reshape(T, d)
    if T == Tp and d == dp:
        x_pad = x2                                  # no per-call activation copy
    else:
        x_pad = jnp.zeros((Tp, dp), x.dtype).at[:T, :d].set(x2)

    # ---- router kernel (router matmul kept in the input dtype: routing
    #      decisions are precision-sensitive and this GEMM is tiny) -----------
    n_rt = Tp // tm
    pmax_p, idx_p, psum_p = pl.pallas_call(
        functools.partial(_router_kernel, n_tokens=T, n_pad_experts=Ep),
        out_shape=(jax.ShapeDtypeStruct((Tp, 1), f32),
                   jax.ShapeDtypeStruct((Tp, 1), jnp.int32),
                   jax.ShapeDtypeStruct((n_rt * 8, Ep), f32)),
        grid_spec=pltpu.PrefetchScalarGridSpec(
            num_scalar_prefetch=0,
            grid=(n_rt,),
            in_specs=[
                pl.BlockSpec((tm, dp), lambda i: (i, 0)),
                pl.BlockSpec((dp, Ep), lambda i: (0, 0)),
                pl.BlockSpec((1, Ep), lambda i: (0, 0)),
            ],
            out_specs=[
                pl.BlockSpec((tm, 1), lambda i: (i, 0)),
                pl.BlockSpec((tm, 1), lambda i: (i, 0)),
                pl.BlockSpec((8, Ep), lambda i: (i, 0)),
            ]),
        compiler_params=pltpu.CompilerParams(
            dimension_semantics=("parallel",),
            vmem_limit_bytes=vmem),
    )(x_pad, w_sw, b_sw)

    pmax = pmax_p[:T, 0]
    idx = idx_p[:T, 0]
    psum = jnp.sum(psum_p.reshape(n_rt, 8, Ep)[:, 0, :E], axis=0)
    counts = jnp.sum(jax.nn.one_hot(idx, E, dtype=f32), axis=0)

    # ---- group tokens by expert (padded contiguous groups), gather-based ----
    c = counts.astype(jnp.int32)
    padded_c = ((c + tm - 1) // tm) * tm
    grp_start_pad = jnp.concatenate(
        [jnp.zeros((1,), jnp.int32), jnp.cumsum(padded_c)[:-1]])
    grp_start_srt = jnp.concatenate(
        [jnp.zeros((1,), jnp.int32), jnp.cumsum(c)[:-1]])
    sort_idx = jnp.argsort(idx).astype(jnp.int32)     # tokens sorted by expert
    sorted_e = idx[sort_idx]
    rank = jnp.arange(T, dtype=jnp.int32) - grp_start_srt[sorted_e]
    dest = grp_start_pad[sorted_e] + rank             # padded slot per sorted tok

    # Static upper bound on padded length: sum_e roundup(c_e, tm) <= T + E*(tm-1)
    num_tiles = (T + E * (tm - 1) + tm - 1) // tm
    P = num_tiles * tm

    gather_idx = jnp.zeros((P,), jnp.int32).at[dest].set(sort_idx)  # slot->token
    slot = jnp.zeros((T,), jnp.int32).at[sort_idx].set(dest)        # token->slot

    x_grouped = x_pad[gather_idx].astype(jnp.bfloat16)   # bf16 MXU operand
    pmax_g = pmax[gather_idx][:, None]                   # (P, 1) f32

    tile_start = jnp.arange(num_tiles, dtype=jnp.int32) * tm
    tile_expert = jnp.minimum(
        jnp.searchsorted(jnp.cumsum(padded_c), tile_start, side="right"),
        E - 1).astype(jnp.int32)
    tile_valid = (tile_start - grp_start_pad[tile_expert]
                  < c[tile_expert]).astype(jnp.int32)

    # ---- grouped-GEMM expert kernel -----------------------------------------
    out_grouped = pl.pallas_call(
        functools.partial(_expert_mlp_kernel, num_layers=L,
                          scale_by_prob=is_scale_prob),
        out_shape=jax.ShapeDtypeStruct((P, dp), x.dtype),
        grid_spec=pltpu.PrefetchScalarGridSpec(
            num_scalar_prefetch=2,                    # tile_expert, tile_valid
            grid=(num_tiles, L),
            in_specs=[
                pl.BlockSpec((tm, dp), lambda i, l, te, tv: (i, 0)),
                pl.BlockSpec((1, 1, dp, dp),
                             lambda i, l, te, tv: (te[i], l, 0, 0)),
                pl.BlockSpec((1, 1, 1, dp),
                             lambda i, l, te, tv: (te[i], l, 0, 0)),
                pl.BlockSpec((tm, 1), lambda i, l, te, tv: (i, 0)),
            ],
            out_specs=pl.BlockSpec((tm, dp), lambda i, l, te, tv: (i, 0)),
            scratch_shapes=[pltpu.VMEM((tm, dp), jnp.float32)]),
        compiler_params=pltpu.CompilerParams(
            dimension_semantics=("parallel", "arbitrary"),
            vmem_limit_bytes=vmem),
    )(tile_expert, tile_valid, x_grouped, w_e, b_e, pmax_g)

    # ---- un-group via gather (no full-width scatter), un-pad ----------------
    out2 = out_grouped[slot][:, :d]
    output = out2.reshape(seq_len, batch, d)
    n_dropped = 0                                      # drop_tokens=False path
    return output, counts, psum, n_dropped, pmax


def _reference(x, w_switch, b_switch, w_experts, b_experts, is_scale_prob=True):
    """Pure-JAX f32 reference mirroring the PyTorch forward (drop_tokens=False)."""
    seq_len, batch, d = x.shape
    n_experts = w_switch.shape[1]
    expert_depth = w_experts.shape[1]
    x2 = x.reshape(-1, d)
    logits = x2 @ w_switch + b_switch
    p = jax.nn.softmax(logits, axis=-1)
    pmax = jnp.max(p, axis=-1)
    idx = jnp.argmax(p, axis=-1)
    outs = []
    for ei in range(n_experts):
        h = x2
        for li in range(expert_depth):
            h = h @ w_experts[ei, li] + b_experts[ei, li]
        outs.append(h)
    outs = jnp.stack(outs, axis=0)                        # (E, T, d)
    out = jnp.take_along_axis(outs, idx[None, :, None], axis=0)[0]
    if is_scale_prob:
        out = out * pmax[:, None]
    counts = jnp.sum(jax.nn.one_hot(idx, n_experts, dtype=jnp.float32), axis=0)
    return (out.reshape(seq_len, batch, d), counts, p.sum(0), 0, pmax)


if __name__ == "__main__":
    # Module hyper-params
    n_experts = 4
    expert_depth = 2
    ffn_dim = 32          # == d_model
    is_scale_prob = True

    # Small input: seq_len=8, batch=2 -> T=16 tokens
    seq_len, batch = 8, 2

    key = jax.random.PRNGKey(0)
    k_x, k_ws, k_bs, k_we, k_be = jax.random.split(key, 5)

    x = jax.random.normal(k_x, (seq_len, batch, ffn_dim), dtype=jnp.float32)
    # Unit-scale switch weights -> well-separated router logits so the argmax
    # routing decision is robust to MXU rounding; 0.1-scale expert weights.
    w_switch = jax.random.normal(k_ws, (ffn_dim, n_experts), dtype=jnp.float32)
    b_switch = 0.1 * jax.random.normal(k_bs, (n_experts,), dtype=jnp.float32)
    w_experts = 0.1 * jax.random.normal(
        k_we, (n_experts, expert_depth, ffn_dim, ffn_dim), dtype=jnp.float32)
    b_experts = 0.1 * jax.random.normal(
        k_be, (n_experts, expert_depth, ffn_dim), dtype=jnp.float32)

    params = prepare_params(w_switch, b_switch, w_experts, b_experts)
    fwd = jax.jit(functools.partial(experts_forward,
                                    is_scale_prob=is_scale_prob, tm=256))
    result = fwd(x, *params)
    jax.block_until_ready(result)

    ref = _reference(x, w_switch, b_switch, w_experts, b_experts,
                     is_scale_prob=is_scale_prob)

    out, counts, psum, n_dropped, pmax = result
    r_out, r_counts, r_psum, r_dropped, r_pmax = ref
    # Tolerances account for bf16 MXU operands in the expert GEMMs and the
    # approximate EUP reciprocal in the router softmax.
    assert jnp.allclose(counts, r_counts, atol=1e-3), "counts mismatch"
    assert jnp.allclose(pmax, r_pmax, atol=2e-2), "route_prob_max mismatch"
    assert jnp.allclose(psum, r_psum, atol=5e-2), "route_prob_sum mismatch"
    assert jnp.allclose(out, r_out, atol=3e-2, rtol=3e-2), "output mismatch"
    assert int(n_dropped) == r_dropped

    print("KERNEL_OK")
</pallas_src>

<mosaic_0001>
module attributes {stable_mosaic.version = 11 : i64} {
  func.func @_router_kernel(%arg0: i32, %arg1: memref<256x128xf32, #tpu.memory_space<vmem>>, %arg2: memref<128x128xf32, #tpu.memory_space<vmem>>, %arg3: memref<1x128xf32, #tpu.memory_space<vmem>>, %arg4: memref<256x1xf32, #tpu.memory_space<vmem>>, %arg5: memref<256x1xi32, #tpu.memory_space<vmem>>, %arg6: memref<8x128xf32, #tpu.memory_space<vmem>>) attributes {dimension_semantics = [#tpu.dimension_semantics<parallel>], iteration_bounds = array<i64: 1>, scalar_prefetch = 0 : i64, scratch_operands = 0 : i64, tpu.core_type = #tpu.core_type<tc>, window_params = [{transform_indices = @transform_0, window_bounds = array<i64: 256, 128>}, {pipeline_mode = #tpu.pipeline_mode<synchronous>, transform_indices = @transform_1, window_bounds = array<i64: 128, 128>}, {pipeline_mode = #tpu.pipeline_mode<synchronous>, transform_indices = @transform_2, window_bounds = array<i64: 1, 128>}, {transform_indices = @transform_3, window_bounds = array<i64: 256, 1>}, {transform_indices = @transform_4, window_bounds = array<i64: 256, 1>}, {transform_indices = @transform_5, window_bounds = array<i64: 8, 128>}]} {
    %c0 = arith.constant 0 : index
    %c0_0 = arith.constant 0 : index
    %0 = vector.load %arg1[%c0, %c0_0] : memref<256x128xf32, #tpu.memory_space<vmem>>, vector<256x128xf32>
    %c0_1 = arith.constant 0 : index
    %c0_2 = arith.constant 0 : index
    %1 = vector.load %arg2[%c0_1, %c0_2] : memref<128x128xf32, #tpu.memory_space<vmem>>, vector<128x128xf32>
    %cst = arith.constant dense<0.000000e+00> : vector<256x128xf32>
    %2 = tpu.matmul %0, %1, %cst {dimension_numbers = #tpu.dot_dimension_numbers<[1], [0], [0], [1], [0, 0, 1, 1], [], []>} : vector<256x128xf32>, vector<128x128xf32>, vector<256x128xf32> -> vector<256x128xf32>
    %c0_3 = arith.constant 0 : index
    %c0_4 = arith.constant 0 : index
    %3 = vector.load %arg3[%c0_3, %c0_4] : memref<1x128xf32, #tpu.memory_space<vmem>>, vector<1x128xf32>
    %4 = vector.broadcast %3 : vector<1x128xf32> to vector<256x128xf32>
    %5 = arith.addf %2, %4 : vector<256x128xf32>
    %cst_5 = arith.constant dense<0xFF800000> : vector<256xf32>
    %6 = vector.multi_reduction <maximumf>, %5, %cst_5 [1] : vector<256x128xf32> to vector<256xf32>
    %7 = vector.shape_cast %6 : vector<256xf32> to vector<256x1xf32>
    %8 = vector.broadcast %7 : vector<256x1xf32> to vector<256x128xf32>
    %9 = arith.subf %5, %8 : vector<256x128xf32>
    %10 = math.exp %9 : vector<256x128xf32>
    %cst_6 = arith.constant dense<0.000000e+00> : vector<256xf32>
    %11 = vector.multi_reduction <add>, %10, %cst_6 [1] : vector<256x128xf32> to vector<256xf32>
    %12 = vector.shape_cast %11 : vector<256xf32> to vector<256x1xf32>
    %13 = tpu.reciprocal %12 {approx = true} : vector<256x1xf32> -> vector<256x1xf32>
    %14 = vector.broadcast %13 : vector<256x1xf32> to vector<256x128xf32>
    %15 = arith.mulf %10, %14 : vector<256x128xf32>
    %cst_7 = arith.constant dense<0xFF800000> : vector<256xf32>
    %16 = vector.multi_reduction <maximumf>, %15, %cst_7 [1] : vector<256x128xf32> to vector<256xf32>
    %17 = vector.shape_cast %16 : vector<256xf32> to vector<256x1xf32>
    %c0_8 = arith.constant 0 : index
    %c0_9 = arith.constant 0 : index
    %18 = vector.load %arg4[%c0_8, %c0_9] : memref<256x1xf32, #tpu.memory_space<vmem>>, vector<256x1xf32>
    tpu.vector_store %arg4[%c0_8, %c0_9], %17 {strides = array<i32>} : memref<256x1xf32, #tpu.memory_space<vmem>>, vector<256x1xf32>,
    %19 = tpu.iota {dimensions = array<i32: 1>} : vector<256x128xi32>
    %20 = vector.broadcast %7 : vector<256x1xf32> to vector<256x128xf32>
    %21 = arith.cmpf oeq, %5, %20 : vector<256x128xf32>
    %c128_i32 = arith.constant 128 : i32
    %22 = vector.broadcast %c128_i32 : i32 to vector<256x128xi32>
    %23 = arith.select %21, %19, %22 : vector<256x128xi1>, vector<256x128xi32>
    %cst_10 = arith.constant dense<2147483647> : vector<256xi32>
    %24 = vector.multi_reduction <minsi>, %23, %cst_10 [1] : vector<256x128xi32> to vector<256xi32>
    %25 = vector.shape_cast %24 : vector<256xi32> to vector<256x1xi32>
    %c0_11 = arith.constant 0 : index
    %c0_12 = arith.constant 0 : index
    %26 = vector.load %arg5[%c0_11, %c0_12] : memref<256x1xi32, #tpu.memory_space<vmem>>, vector<256x1xi32>
    tpu.vector_store %arg5[%c0_11, %c0_12], %25 {strides = array<i32>} : memref<256x1xi32, #tpu.memory_space<vmem>>, vector<256x1xi32>,
    %27 = tpu.iota {dimensions = array<i32: 0>} : vector<256x128xi32>
    %c256_i32 = arith.constant 256 : i32
    %28 = arith.muli %arg0, %c256_i32 : i32
    %29 = vector.broadcast %28 : i32 to vector<256x128xi32>
    %30 = arith.addi %27, %29 : vector<256x128xi32>
    %c16_i32 = arith.constant 16 : i32
    %31 = vector.broadcast %c16_i32 : i32 to vector<256x128xi32>
    %32 = arith.cmpi slt, %30, %31 : vector<256x128xi32>
    %cst_13 = arith.constant 0.000000e+00 : f32
    %33 = vector.broadcast %cst_13 : f32 to vector<256x128xf32>
    %34 = arith.select %32, %15, %33 : vector<256x128xi1>, vector<256x128xf32>
    %cst_14 = arith.constant dense<0.000000e+00> : vector<128xf32>
    %35 = vector.multi_reduction <add>, %34, %cst_14 [0] : vector<256x128xf32> to vector<128xf32>
    %36 = vector.shape_cast %35 : vector<128xf32> to vector<1x128xf32>
    %37 = vector.shape_cast %36 : vector<1x128xf32> to vector<1x128xf32>
    %38 = vector.broadcast %37 : vector<1x128xf32> to vector<8x128xf32>
    %c0_15 = arith.constant 0 : index
    %c0_16 = arith.constant 0 : index
    %39 = vector.load %arg6[%c0_15, %c0_16] : memref<8x128xf32, #tpu.memory_space<vmem>>, vector<8x128xf32>
    tpu.vector_store %arg6[%c0_15, %c0_16], %38 {strides = array<i32>} : memref<8x128xf32, #tpu.memory_space<vmem>>, vector<8x128xf32>,
    return
  }
  func.func @transform_0(%arg0: i32) -> (i32, i32) {
    %c0_i32 = arith.constant 0 : i32
    %c0_i32_0 = arith.constant 0 : i32
    return %arg0, %c0_i32 : i32, i32
  }
  func.func @transform_1(%arg0: i32) -> (i32, i32) {
    %c0_i32 = arith.constant 0 : i32
    %c0_i32_0 = arith.constant 0 : i32
    %c0_i32_1 = arith.constant 0 : i32
    return %c0_i32, %c0_i32_0 : i32, i32
  }
  func.func @transform_2(%arg0: i32) -> (i32, i32) {
    %c0_i32 = arith.constant 0 : i32
    %c0_i32_0 = arith.constant 0 : i32
    %c0_i32_1 = arith.constant 0 : i32
    return %c0_i32, %c0_i32_0 : i32, i32
  }
  func.func @transform_3(%arg0: i32) -> (i32, i32) {
    %c0_i32 = arith.constant 0 : i32
    %c0_i32_0 = arith.constant 0 : i32
    return %arg0, %c0_i32 : i32, i32
  }
  func.func @transform_4(%arg0: i32) -> (i32, i32) {
    %c0_i32 = arith.constant 0 : i32
    %c0_i32_0 = arith.constant 0 : i32
    return %arg0, %c0_i32 : i32, i32
  }
  func.func @transform_5(%arg0: i32) -> (i32, i32) {
    %c0_i32 = arith.constant 0 : i32
    %c0_i32_0 = arith.constant 0 : i32
    return %arg0, %c0_i32 : i32, i32
  }
}

module attributes {stable_mosaic.version = 11 : i64} {
  func.func @_expert_mlp_kernel(%arg0: i32, %arg1: i32, %arg2: memref<5xi32, #tpu.memory_space<smem>>, %arg3: memref<5xi32, #tpu.memory_space<smem>>, %arg4: memref<256x128xbf16, #tpu.memory_space<vmem>>, %arg5: memref<1x1x128x128xbf16, #tpu.memory_space<vmem>>, %arg6: memref<1x1x1x128xf32, #tpu.memory_space<vmem>>, %arg7: memref<256x1xf32, #tpu.memory_space<vmem>>, %arg8: memref<256x128xf32, #tpu.memory_space<vmem>>, %arg9: memref<256x128xf32, #tpu.memory_space<vmem>>) attributes {dimension_semantics = [#tpu.dimension_semantics<parallel>, #tpu.dimension_semantics<arbitrary>], iteration_bounds = array<i64: 5, 2>, scalar_prefetch = 2 : i64, scratch_operands = 1 : i64, tpu.core_type = #tpu.core_type<tc>, window_params = [{transform_indices = @transform_0, window_bounds = array<i64: 256, 128>}, {transform_indices = @transform_1, window_bounds = array<i64: 1, 1, 128, 128>}, {transform_indices = @transform_2, window_bounds = array<i64: 1, 1, 1, 128>}, {transform_indices = @transform_3, window_bounds = array<i64: 256, 1>}, {transform_indices = @transform_4, window_bounds = array<i64: 256, 128>}]} {
    %0 = arith.index_cast %arg0 : i32 to index
    %1 = memref.load %arg3[%0] : memref<5xi32, #tpu.memory_space<smem>>
    %c0_i32 = arith.constant 0 : i32
    %2 = arith.cmpi sgt, %1, %c0_i32 : i32
    %3 = arith.extui %2 : i1 to i32
    %c0_i32_0 = arith.constant 0 : i32
    %4 = arith.cmpi ne, %3, %c0_i32_0 : i32
    scf.if %4 {
      %c0_i32_1 = arith.constant 0 : i32
      %5 = arith.cmpi eq, %arg1, %c0_i32_1 : i32
      %6 = arith.extui %5 : i1 to i32
      %c0_i32_2 = arith.constant 0 : i32
      %7 = arith.cmpi ne, %6, %c0_i32_2 : i32
      scf.if %7 {
        %c0_15 = arith.constant 0 : index
        %c0_16 = arith.constant 0 : index
        %23 = vector.load %arg4[%c0_15, %c0_16] : memref<256x128xbf16, #tpu.memory_space<vmem>>, vector<256x128xbf16>
        %24 = arith.extf %23 : vector<256x128xbf16> to vector<256x128xf32>
        %c0_17 = arith.constant 0 : index
        %c0_18 = arith.constant 0 : index
        %25 = vector.load %arg9[%c0_17, %c0_18] : memref<256x128xf32, #tpu.memory_space<vmem>>, vector<256x128xf32>
        tpu.vector_store %arg9[%c0_17, %c0_18], %24 {strides = array<i32>} : memref<256x128xf32, #tpu.memory_space<vmem>>, vector<256x128xf32>,
      } else {
      }
      %c0 = arith.constant 0 : index
      %c0_3 = arith.constant 0 : index
      %8 = vector.load %arg9[%c0, %c0_3] : memref<256x128xf32, #tpu.memory_space<vmem>>, vector<256x128xf32>
      %9 = arith.truncf %8 : vector<256x128xf32> to vector<256x128xbf16>
      %c0_4 = arith.constant 0 : index
      %c0_5 = arith.constant 0 : index
      %c0_6 = arith.constant 0 : index
      %c0_7 = arith.constant 0 : index
      %10 = vector.load %arg5[%c0_4, %c0_5, %c0_6, %c0_7] : memref<1x1x128x128xbf16, #tpu.memory_space<vmem>>, vector<1x1x128x128xbf16>
      %11 = vector.shape_cast %10 : vector<1x1x128x128xbf16> to vector<128x128xbf16>
      %cst = arith.constant dense<0.000000e+00> : vector<256x128xf32>
      %12 = tpu.matmul %9, %11, %cst {dimension_numbers = #tpu.dot_dimension_numbers<[1], [0], [0], [1], [0, 0, 1, 1], [], []>} : vector<256x128xbf16>, vector<128x128xbf16>, vector<256x128xf32> -> vector<256x128xf32>
      %c0_8 = arith.constant 0 : index
      %c0_9 = arith.constant 0 : index
      %c0_10 = arith.constant 0 : index
      %c0_11 = arith.constant 0 : index
      %13 = vector.load %arg6[%c0_8, %c0_9, %c0_10, %c0_11] : memref<1x1x1x128xf32, #tpu.memory_space<vmem>>, vector<1x1x1x128xf32>
      %14 = vector.shape_cast %13 : vector<1x1x1x128xf32> to vector<1x128xf32>
      %15 = vector.broadcast %14 : vector<1x128xf32> to vector<256x128xf32>
      %16 = arith.addf %12, %15 : vector<256x128xf32>
      %c1_i32 = arith.constant 1 : i32
      %17 = arith.cmpi slt, %arg1, %c1_i32 : i32
      %18 = arith.extui %17 : i1 to i32
      %c0_i32_12 = arith.constant 0 : i32
      %19 = arith.cmpi ne, %18, %c0_i32_12 : i32
      scf.if %19 {
        %c0_15 = arith.constant 0 : index
        %c0_16 = arith.constant 0 : index
        %23 = vector.load %arg9[%c0_15, %c0_16] : memref<256x128xf32, #tpu.memory_space<vmem>>, vector<256x128xf32>
        tpu.vector_store %arg9[%c0_15, %c0_16], %16 {strides = array<i32>} : memref<256x128xf32, #tpu.memory_space<vmem>>, vector<256x128xf32>,
      } else {
      }
      %c1_i32_13 = arith.constant 1 : i32
      %20 = arith.cmpi eq, %arg1, %c1_i32_13 : i32
      %21 = arith.extui %20 : i1 to i32
      %c0_i32_14 = arith.constant 0 : i32
      %22 = arith.cmpi ne, %21, %c0_i32_14 : i32
      scf.if %22 {
        %c0_15 = arith.constant 0 : index
        %c0_16 = arith.constant 0 : index
        %23 = vector.load %arg7[%c0_15, %c0_16] : memref<256x1xf32, #tpu.memory_space<vmem>>, vector<256x1xf32>
        %24 = vector.broadcast %23 : vector<256x1xf32> to vector<256x128xf32>
        %25 = arith.mulf %16, %24 : vector<256x128xf32>
        %c0_17 = arith.constant 0 : index
        %c0_18 = arith.constant 0 : index
        %26 = vector.load %arg8[%c0_17, %c0_18] : memref<256x128xf32, #tpu.memory_space<vmem>>, vector<256x128xf32>
        tpu.vector_store %arg8[%c0_17, %c0_18], %25 {strides = array<i32>} : memref<256x128xf32, #tpu.memory_space<vmem>>, vector<256x128xf32>,
      } else {
      }
    } else {
    }
    return
  }
  func.func @transform_0(%arg0: i32, %arg1: i32, %arg2: memref<5xi32, #tpu.memory_space<smem>>, %arg3: memref<5xi32, #tpu.memory_space<smem>>) -> (i32, i32) {
    %c0_i32 = arith.constant 0 : i32
    %c0_i32_0 = arith.constant 0 : i32
    return %arg0, %c0_i32 : i32, i32
  }
  func.func @transform_1(%arg0: i32, %arg1: i32, %arg2: memref<5xi32, #tpu.memory_space<smem>>, %arg3: memref<5xi32, #tpu.memory_space<smem>>) -> (i32, i32, i32, i32) {
    %0 = arith.index_cast %arg0 : i32 to index
    %1 = memref.load %arg2[%0] : memref<5xi32, #tpu.memory_space<smem>>
    %c0_i32 = arith.constant 0 : i32
    %c0_i32_0 = arith.constant 0 : i32
    %c0_i32_1 = arith.constant 0 : i32
    return %1, %arg1, %c0_i32, %c0_i32_0 : i32, i32, i32, i32
  }
  func.func @transform_2(%arg0: i32, %arg1: i32, %arg2: memref<5xi32, #tpu.memory_space<smem>>, %arg3: memref<5xi32, #tpu.memory_space<smem>>) -> (i32, i32, i32, i32) {
    %0 = arith.index_cast %arg0 : i32 to index
    %1 = memref.load %arg2[%0] : memref<5xi32, #tpu.memory_space<smem>>
    %c0_i32 = arith.constant 0 : i32
    %c0_i32_0 = arith.constant 0 : i32
    %c0_i32_1 = arith.constant 0 : i32
    return %1, %arg1, %c0_i32, %c0_i32_0 : i32, i32, i32, i32
  }
  func.func @transform_3(%arg0: i32, %arg1: i32, %arg2: memref<5xi32, #tpu.memory_space<smem>>, %arg3: memref<5xi32, #tpu.memory_space<smem>>) -> (i32, i32) {
    %c0_i32 = arith.constant 0 : i32
    %c0_i32_0 = arith.constant 0 : i32
    return %arg0, %c0_i32 : i32, i32
  }
  func.func @transform_4(%arg0: i32, %arg1: i32, %arg2: memref<5xi32, #tpu.memory_space<smem>>, %arg3: memref<5xi32, #tpu.memory_space<smem>>) -> (i32, i32) {
    %c0_i32 = arith.constant 0 : i32
    %c0_i32_0 = arith.constant 0 : i32
    return %arg0, %c0_i32 : i32, i32
  }
}

</mosaic_0001>

<bundles_post_ra>
// kernel: custom-call.1
= control target key start
LH: loop header
LB: loop body
LE: loop exit
PB: predicated region body
PF: predicated region fallthrough
CT: control target
= control target key end

     0   :  { %s6_s0 = inlined_call_operand.vmem [shape: u32[5], index: 0, kind: output, shape index: {}]  }

// kernel: experts_forward.2
= control target key start
LH: loop header
LB: loop body
LE: loop exit
PB: predicated region body
PF: predicated region fallthrough
CT: control target
= control target key end

     0   :  { %s2803_s1 = inlined_call_operand.vmem [shape: f32[128,128], index: 1, kind: input, shape index: {}]   ;;  %s2804_s2 = inlined_call_operand.vmem [shape: f32[1,128], index: 2, kind: input, shape index: {}]   ;;  %s2805_s0 = inlined_call_operand.vmem [shape: f32[256,128], index: 0, kind: input, shape index: {}]   ;;  %s2806_s5 = inlined_call_operand.vmem [shape: f32[8,128], index: 5, kind: output, shape index: {2}]   ;;  %s2807_s4 = inlined_call_operand.vmem [shape: s32[256,1], index: 4, kind: output, shape index: {1}]   ;;  %s2808_s3 = inlined_call_operand.vmem [shape: f32[256,1], index: 3, kind: output, shape index: {0}]  }
   0x1   :  { %v64_v0 = vld [vmem:[%s2803_s1 + $0x78] sm:$0xff]  ;;  %v63_v1 = vld [vmem:[%s2803_s1 + $0x70] sm:$0xff]  ;;  %v62_v2 = vld [vmem:[%s2803_s1 + $0x68] sm:$0xff] }
   0x2   :  { %69 = vmatpush.msra.mxu0 %v64_v0  ;;  %1294 = vmatpush.msra.mxu1 %v64_v0  ;;  %v61_v3 = vld [vmem:[%s2803_s1 + $0x60] sm:$0xff]  ;;  %v60_v4 = vld [vmem:[%s2803_s1 + $0x58] sm:$0xff]  ;;  %v59_v5 = vld [vmem:[%s2803_s1 + $0x50] sm:$0xff] }
   0x3   :  { %1295 = vmatpush.msra.mxu2 %v64_v0  ;;  %1296 = vmatpush.msra.mxu3 %v64_v0  ;;  %v58_v6 = vld [vmem:[%s2803_s1 + $0x48] sm:$0xff]  ;;  %v57_v7 = vld [vmem:[%s2803_s1 + $0x40] sm:$0xff]  ;;  %v56_v8 = vld [vmem:[%s2803_s1 + $0x38] sm:$0xff] }
   0x4   :  { %70 = vmatpush.msra.mxu0 %v63_v1  ;;  %1297 = vmatpush.msra.mxu1 %v63_v1  ;;  %v55_v9 = vld [vmem:[%s2803_s1 + $0x30] sm:$0xff]  ;;  %v54_v10 = vld [vmem:[%s2803_s1 + $0x28] sm:$0xff]  ;;  %v53_v11 = vld [vmem:[%s2803_s1 + $0x20] sm:$0xff] }
   0x5   :  { %1298 = vmatpush.msra.mxu2 %v63_v1  ;;  %1299 = vmatpush.msra.mxu3 %v63_v1  ;;  %v52_v12 = vld [vmem:[%s2803_s1 + $0x18] sm:$0xff]  ;;  %v51_v13 = vld [vmem:[%s2803_s1 + $0x10] sm:$0xff]  ;;  %v50_v14 = vld [vmem:[%s2803_s1 + $0x8] sm:$0xff] }
   0x6   :  { %71 = vmatpush.msra.mxu0 %v62_v2  ;;  %1300 = vmatpush.msra.mxu1 %v62_v2  ;;  %v49_v15 = vld [vmem:[%s2803_s1] sm:$0xff]  ;;  %v18_v20 = vld [vmem:[%s2805_s0 + $0x8] sm:$0xff]  ;;  %v19_v24 = vld [vmem:[%s2805_s0 + $0x10] sm:$0xff] }
   0x7   :  { %1301 = vmatpush.msra.mxu2 %v62_v2  ;;  %1302 = vmatpush.msra.mxu3 %v62_v2  ;;  %v17_v16 = vld [vmem:[%s2805_s0] sm:$0xff]  ;;  %v26_v21 = vld [vmem:[%s2805_s0 + $0x48] sm:$0xff]  ;;  %v27_v25 = vld [vmem:[%s2805_s0 + $0x50] sm:$0xff] }
   0x8   :  { %72 = vmatpush.msra.mxu0 %v61_v3  ;;  %1303 = vmatpush.msra.mxu1 %v61_v3  ;;  %v25_v17 = vld [vmem:[%s2805_s0 + $0x40] sm:$0xff]  ;;  %v34_v22 = vld [vmem:[%s2805_s0 + $0x88] sm:$0xff]  ;;  %v43_v26 = vld [vmem:[%s2805_s0 + $0xd0] sm:$0xff] }
   0x9   :  { %1304 = vmatpush.msra.mxu2 %v61_v3  ;;  %1305 = vmatpush.msra.mxu3 %v61_v3  ;;  %v33_v18 = vld [vmem:[%s2805_s0 + $0x80] sm:$0xff]  ;;  %v42_v23 = vld [vmem:[%s2805_s0 + $0xc8] sm:$0xff]  ;;  %v35_v27 = vld [vmem:[%s2805_s0 + $0x90] sm:$0xff] }
   0xa   :  { %73 = vmatpush.msra.mxu0 %v60_v4  ;;  %1306 = vmatpush.msra.mxu1 %v60_v4  ;;  %v41_v19 = vld [vmem:[%s2805_s0 + $0xc0] sm:$0xff]  ;;  %v20_v28 = vld [vmem:[%s2805_s0 + $0x18] sm:$0xff]  ;;  %v22_v36 = vld [vmem:[%s2805_s0 + $0x28] sm:$0xff] }
   0xb   :  { %1307 = vmatpush.msra.mxu2 %v60_v4  ;;  %1308 = vmatpush.msra.mxu3 %v60_v4  ;;  %v28_v29 = vld [vmem:[%s2805_s0 + $0x58] sm:$0xff]  ;;  %v21_v32 = vld [vmem:[%s2805_s0 + $0x20] sm:$0xff]  ;;  %v30_v37 = vld [vmem:[%s2805_s0 + $0x68] sm:$0xff] }
   0xc   :  { %74 = vmatpush.msra.mxu0 %v59_v5  ;;  %1309 = vmatpush.msra.mxu1 %v59_v5  ;;  %v36_v30 = vld [vmem:[%s2805_s0 + $0x98] sm:$0xff]  ;;  %v29_v33 = vld [vmem:[%s2805_s0 + $0x60] sm:$0xff]  ;;  %v38_v38 = vld [vmem:[%s2805_s0 + $0xa8] sm:$0xff] }
   0xd   :  { %1310 = vmatpush.msra.mxu2 %v59_v5  ;;  %1311 = vmatpush.msra.mxu3 %v59_v5  ;;  %v44_v31 = vld [vmem:[%s2805_s0 + $0xd8] sm:$0xff]  ;;  %v37_v34 = vld [vmem:[%s2805_s0 + $0xa0] sm:$0xff]  ;;  %v46_v39 = vld [vmem:[%s2805_s0 + $0xe8] sm:$0xff] }
   0xe   :  { %75 = vmatpush.msra.mxu0 %v58_v6  ;;  %1312 = vmatpush.msra.mxu1 %v58_v6  ;;  %v45_v35 = vld [vmem:[%s2805_s0 + $0xe0] sm:$0xff]  ;;  %v23_v40 = vld [vmem:[%s2805_s0 + $0x30] sm:$0xff]  ;;  %v24_v44 = vld [vmem:[%s2805_s0 + $0x38] sm:$0xff] }
   0xf   :  { %1313 = vmatpush.msra.mxu2 %v58_v6  ;;  %1314 = vmatpush.msra.mxu3 %v58_v6  ;;  %v31_v41 = vld [vmem:[%s2805_s0 + $0x70] sm:$0xff]  ;;  %v32_v45 = vld [vmem:[%s2805_s0 + $0x78] sm:$0xff]  ;;  %v1648_v48 = vld [vmem:[%s2804_s2] ss:$0 sm:$0xff] }
  0x10   :  { %76 = vmatpush.msra.mxu0 %v57_v7  ;;  %1315 = vmatpush.msra.mxu1 %v57_v7  ;;  %v39_v42 = vld [vmem:[%s2805_s0 + $0xb0] sm:$0xff]  ;;  %v40_v46 = vld [vmem:[%s2805_s0 + $0xb8] sm:$0xff] }
  0x11   :  { %1316 = vmatpush.msra.mxu2 %v57_v7  ;;  %1317 = vmatpush.msra.mxu3 %v57_v7  ;;  %v47_v43 = vld [vmem:[%s2805_s0 + $0xf0] sm:$0xff]  ;;  %v48_v47 = vld [vmem:[%s2805_s0 + $0xf8] sm:$0xff] }
  0x12   :  { %77 = vmatpush.msra.mxu0 %v56_v8  ;;  %1318 = vmatpush.msra.mxu1 %v56_v8 }
  0x13   :  { %1319 = vmatpush.msra.mxu2 %v56_v8  ;;  %1320 = vmatpush.msra.mxu3 %v56_v8 }
  0x14   :  { %78 = vmatpush.msra.mxu0 %v55_v9  ;;  %1321 = vmatpush.msra.mxu1 %v55_v9 }
  0x15   :  { %1322 = vmatpush.msra.mxu2 %v55_v9  ;;  %1323 = vmatpush.msra.mxu3 %v55_v9 }
  0x16   :  { %79 = vmatpush.msra.mxu0 %v54_v10  ;;  %1324 = vmatpush.msra.mxu1 %v54_v10 }
  0x17   :  { %1325 = vmatpush.msra.mxu2 %v54_v10  ;;  %1326 = vmatpush.msra.mxu3 %v54_v10 }
  0x18   :  { %80 = vmatpush.msra.mxu0 %v53_v11  ;;  %1327 = vmatpush.msra.mxu1 %v53_v11 }
  0x19   :  { %1328 = vmatpush.msra.mxu2 %v53_v11  ;;  %1329 = vmatpush.msra.mxu3 %v53_v11 }
  0x1a   :  { %81 = vmatpush.msra.mxu0 %v52_v12  ;;  %1330 = vmatpush.msra.mxu1 %v52_v12 }
  0x1b   :  { %1331 = vmatpush.msra.mxu2 %v52_v12  ;;  %1332 = vmatpush.msra.mxu3 %v52_v12 }
  0x1c   :  { %82 = vmatpush.msra.mxu0 %v51_v13  ;;  %1333 = vmatpush.msra.mxu1 %v51_v13 }
  0x1d   :  { %1334 = vmatpush.msra.mxu2 %v51_v13  ;;  %1335 = vmatpush.msra.mxu3 %v51_v13 }
  0x1e   :  { %83 = vmatpush.msra.mxu0 %v50_v14  ;;  %1336 = vmatpush.msra.mxu1 %v50_v14 }
  0x1f   :  { %1337 = vmatpush.msra.mxu2 %v50_v14  ;;  %1338 = vmatpush.msra.mxu3 %v50_v14 }
  0x20   :  { %84 = vmatpush.msra.mxu0 %v49_v15  ;;  %1339 = vmatpush.msra.mxu1 %v49_v15 }
  0x21   :  { %1340 = vmatpush.msra.mxu2 %v49_v15  ;;  %1341 = vmatpush.msra.mxu3 %v49_v15 }
  0x22   :  { %85 = vmatmul.f32.vlgmr.msra.gmra.mxu0 %v17_v16  ;;  %109 = vmatmul.f32.vlgmr.msra.gmra.mxu1 %v25_v17 }
  0x23   :  { %133 = vmatmul.f32.vlgmr.msra.gmra.mxu2 %v33_v18  ;;  %157 = vmatmul.f32.vlgmr.msra.gmra.mxu3 %v41_v19 }
  0x2a   :  { %88 = vmatmul.f32.gmra.mxu0 %v18_v20  ;;  %112 = vmatmul.f32.gmra.mxu1 %v26_v21 }
  0x2b   :  { %136 = vmatmul.f32.gmra.mxu2 %v34_v22  ;;  %160 = vmatmul.f32.gmra.mxu3 %v42_v23 }
  0x32   :  { %91 = vmatmul.f32.gmra.mxu0 %v19_v24  ;;  %115 = vmatmul.f32.gmra.mxu1 %v27_v25 }
  0x33   :  { %163 = vmatmul.f32.gmra.mxu3 %v43_v26  ;;  %139 = vmatmul.f32.gmra.mxu2 %v35_v27 }
  0x3a   :  { %94 = vmatmul.f32.gmra.mxu0 %v20_v28  ;;  %118 = vmatmul.f32.gmra.mxu1 %v28_v29 }
  0x3b   :  { %142 = vmatmul.f32.gmra.mxu2 %v36_v30  ;;  %166 = vmatmul.f32.gmra.mxu3 %v44_v31 }
  0x42   :  { %97 = vmatmul.f32.gmra.mxu0 %v21_v32  ;;  %121 = vmatmul.f32.gmra.mxu1 %v29_v33 }
  0x43   :  { %145 = vmatmul.f32.gmra.mxu2 %v37_v34  ;;  %169 = vmatmul.f32.gmra.mxu3 %v45_v35 }
  0x4a   :  { %100 = vmatmul.f32.gmra.mxu0 %v22_v36  ;;  %124 = vmatmul.f32.gmra.mxu1 %v30_v37 }
  0x4b   :  { %148 = vmatmul.f32.gmra.mxu2 %v38_v38  ;;  %172 = vmatmul.f32.gmra.mxu3 %v46_v39 }
  0x52   :  { %103 = vmatmul.f32.gmra.mxu0 %v23_v40  ;;  %127 = vmatmul.f32.gmra.mxu1 %v31_v41 }
  0x53   :  { %151 = vmatmul.f32.gmra.mxu2 %v39_v42  ;;  %175 = vmatmul.f32.gmra.mxu3 %v47_v43 }
  0x5a   :  { %106 = vmatmul.f32.gmra.mxu0 %v24_v44  ;;  %130 = vmatmul.f32.gmra.mxu1 %v32_v45 }
  0x5b   :  { %154 = vmatmul.f32.gmra.mxu2 %v40_v46  ;;  %178 = vmatmul.f32.gmra.mxu3 %v48_v47 }
  0x9f   :  { %v86_v49 = vpop.f32.mrf.mxu0  ;;  %v110_v50 = vpop.f32.mrf.mxu1 }
  0xa0   :  { %v1651_v51 = vadd.f32 %v1648_v48, %v86_v49  ;;  %v1654_v52 = vadd.f32 %v1648_v48, %v110_v50  ;;  %v567_v50 = vlaneseq }
  0xa2   :  { %198 = vmax.xlane.f32.xlu2 %v1654_v52  ;;  %182 = vmax.xlane.f32.xlu0 %v1651_v51 }
  0xa6   :  { %v134_v53 = vpop.f32.mrf.mxu2  ;;  %v158_v54 = vpop.f32.mrf.mxu3 }
  0xa7   :  { %v1659_v55 = vadd.f32 %v1648_v48, %v134_v53  ;;  %v1662_v56 = vadd.f32 %v1648_v48, %v158_v54  ;;  %v89_v57 = vpop.f32.mrf.mxu0  ;;  %v113_v58 = vpop.f32.mrf.mxu1  ;;  %v1778_v53 = vand.u32 127, %v567_v50 }
  0xa8   :  { %v1667_v59 = vadd.f32 %v1648_v48, %v89_v57  ;;  %v1682_v3 = vadd.f32 %v1648_v48, %v113_v58 }
  0xa9   :  { %214 = vmax.xlane.f32.xlu1 %v1659_v55 }
  0xaa   :  { %230 = vmax.xlane.f32.xlu0 %v1662_v56 }
  0xae   :  { %v137_v60 = vpop.f32.mrf.mxu2  ;;  %v161_v61 = vpop.f32.mrf.mxu3 }
  0xaf   :  { %v1670_v62 = vadd.f32 %v1648_v48, %v137_v60  ;;  %v1673_v63 = vadd.f32 %v1648_v48, %v161_v61  ;;  %v92_v0 = vpop.f32.mrf.mxu0  ;;  %v116_v1 = vpop.f32.mrf.mxu1 }
  0xb0   :  { %v1679_v2 = vadd.f32 %v1648_v48, %v92_v0  ;;  %v1691_v9 = vadd.f32 %v1648_v48, %v116_v1 }
  0xb1   :  { %232 = vmax.xlane.f32.xlu1 %v1673_v63  ;;  %216 = vmax.xlane.f32.xlu2 %v1670_v62 }
  0xb2   :  { %184 = vmax.xlane.f32.xlu0 %v1667_v59 }
  0xb6   :  { %v164_v4 = vpop.f32.mrf.mxu3  ;;  %v140_v5 = vpop.f32.mrf.mxu2 }
  0xb7   :  { %v1685_v6 = vadd.f32 %v1648_v48, %v164_v4  ;;  %v95_v7 = vpop.f32.mrf.mxu0  ;;  %v119_v8 = vpop.f32.mrf.mxu1  ;;  %v1697_v11 = vadd.f32 %v1648_v48, %v140_v5 }
  0xb8   :  { %v1694_v10 = vadd.f32 %v1648_v48, %v119_v8  ;;  %v1703_v15 = vadd.f32 %v1648_v48, %v95_v7 }
  0xb9   :  { %234 = vmax.xlane.f32.xlu2 %v1685_v6  ;;  %186 = vmax.xlane.f32.xlu1 %v1679_v2 }
  0xba   :  { %200 = vmax.xlane.f32.xlu0 %v1682_v3 }
  0xbe   :  { %v143_v12 = vpop.f32.mrf.mxu2  ;;  %v167_v14 = vpop.f32.mrf.mxu3 }
  0xbf   :  { %v98_v13 = vpop.f32.mrf.mxu0  ;;  %v1709_v17 = vadd.f32 %v1648_v48, %v167_v14  ;;  %v122_v19 = vpop.f32.mrf.mxu1  ;;  %v1715_v20 = vadd.f32 %v1648_v48, %v143_v12 }
  0xc0   :  { %v1706_v16 = vadd.f32 %v1648_v48, %v98_v13  ;;  %v1721_v22 = vadd.f32 %v1648_v48, %v122_v19 }
  0xc1   :  { %204 = vmax.xlane.f32.xlu2 %v1694_v10  ;;  %202 = vmax.xlane.f32.xlu1 %v1691_v9 }
  0xc2   :  { %218 = vmax.xlane.f32.xlu0 %v1697_v11 }
  0xc6   :  { %v146_v18 = vpop.f32.mrf.mxu2  ;;  %v170_v23 = vpop.f32.mrf.mxu3 }
  0xc7   :  { %v1718_v21 = vadd.f32 %v1648_v48, %v146_v18  ;;  %v101_v24 = vpop.f32.mrf.mxu0  ;;  %v1730_v27 = vadd.f32 %v1648_v48, %v170_v23  ;;  %v125_v29 = vpop.f32.mrf.mxu1 }
  0xc8   :  { %v1727_v26 = vadd.f32 %v1648_v48, %v101_v24  ;;  %v1739_v32 = vadd.f32 %v1648_v48, %v125_v29 }
  0xc9   :  { %190 = vmax.xlane.f32.xlu2 %v1706_v16  ;;  %188 = vmax.xlane.f32.xlu1 %v1703_v15 }
  0xca   :  { %236 = vmax.xlane.f32.xlu0 %v1709_v17 }
  0xce   :  { %v149_v25 = vpop.f32.mrf.mxu2  ;;  %v173_v30 = vpop.f32.mrf.mxu3 }
  0xcf   :  { %v1733_v28 = vadd.f32 %v1648_v48, %v149_v25  ;;  %v104_v31 = vpop.f32.mrf.mxu0  ;;  %v1742_v33 = vadd.f32 %v1648_v48, %v173_v30  ;;  %v128_v36 = vpop.f32.mrf.mxu1 }
  0xd0   :  { %v1745_v34 = vadd.f32 %v1648_v48, %v104_v31  ;;  %v1751_v38 = vadd.f32 %v1648_v48, %v128_v36 }
  0xd1   :  { %222 = vmax.xlane.f32.xlu2 %v1718_v21  ;;  %220 = vmax.xlane.f32.xlu1 %v1715_v20 }
  0xd2   :  { %206 = vmax.xlane.f32.xlu0 %v1721_v22 }
  0xd6   :  { %v152_v35 = vpop.f32.mrf.mxu2  ;;  %v176_v37 = vpop.f32.mrf.mxu3 }
  0xd7   :  { %v1754_v39 = vadd.f32 %v1648_v48, %v152_v35  ;;  %v1757_v40 = vadd.f32 %v1648_v48, %v176_v37  ;;  %v107_v41 = vpop.f32.mrf.mxu0  ;;  %v131_v43 = vpop.f32.mrf.mxu1 }
  0xd8   :  { %v1763_v44 = vadd.f32 %v1648_v48, %v107_v41  ;;  %v1769_v46 = vadd.f32 %v1648_v48, %v131_v43 }
  0xd9   :  { %192 = vmax.xlane.f32.xlu2 %v1727_v26  ;;  %238 = vmax.xlane.f32.xlu1 %v1730_v27 }
  0xda   :  { %224 = vmax.xlane.f32.xlu0 %v1733_v28 }
  0xde   :  { %v155_v42 = vpop.f32.mrf.mxu2  ;;  %v179_v47 = vpop.f32.mrf.mxu3 }
  0xdf   :  { %v1766_v45 = vadd.f32 %v1648_v48, %v155_v42  ;;  %v1775_v49 = vadd.f32 %v1648_v48, %v179_v47 }
  0xe1   :  { %240 = vmax.xlane.f32.xlu2 %v1742_v33  ;;  %208 = vmax.xlane.f32.xlu1 %v1739_v32 }
  0xe2   :  { %194 = vmax.xlane.f32.xlu0 %v1745_v34 }
  0xe9   :  { %210 = vmax.xlane.f32.xlu2 %v1751_v38  ;;  %226 = vmax.xlane.f32.xlu1 %v1754_v39 }
  0xea   :  { %242 = vmax.xlane.f32.xlu0 %v1757_v40 }
  0xf1   :  { %228 = vmax.xlane.f32.xlu2 %v1766_v45  ;;  %196 = vmax.xlane.f32.xlu1 %v1763_v44 }
  0xf2   :  { %212 = vmax.xlane.f32.xlu0 %v1769_v46 }
  0xf9   :  { %244 = vmax.xlane.f32.xlu1 %v1775_v49 }
 0x115   :  { %v199_v54 = vpop.xlane.xlu2 %198  ;;  %v183_v57 = vpop.xlane.xlu0 %182 }
 0x116   :  { %v254_v58 = vsub.f32 %v1654_v52, %v199_v54  ;;  %vm577_vm0 = vcmp.eq.f32.partialorder %v1654_v52, %v199_v54  ;;  %v246_v60 = vsub.f32 %v1651_v51, %v183_v57  ;;  %vm569_vm1 = vcmp.eq.f32.partialorder %v1651_v51, %v183_v57 }
 0x117   :  { %v1785_v61 = vsel %vm577_vm0, %v1778_v53, 128  ;;  %v1788_v48 = vsel %vm569_vm1, %v1778_v53, 128 }
 0x118   :  { %v278_v0 = vmul.f32 1.442695, %v246_v60  ;;  %v746_v1 = vshra.s32 %v1785_v61, 16  ;;  %v634_v4 = vshra.s32 %v1788_v48, 16  ;;  %v294_v5 = vmul.f32 1.442695, %v254_v58 }
 0x11a   :  { %v1792_v7 = vcvt.s32.f32 %v746_v1  ;;  %v1794_v8 = vcvt.s32.f32 %v634_v4  ;;  %1343 = vpow2.f32 %v278_v0 }
 0x11b   :  { %1345 = vpow2.f32 %v294_v5 }
 0x11c   :  { %v215_v52 = vpop.xlane.xlu1 %214  ;;  %749 = vmin.xlane.f32.xlu1 %v1792_v7  ;;  %637 = vmin.xlane.f32.xlu0 %v1794_v8 }
 0x11d   :  { %v231_v51 = vpop.xlane.xlu0 %230  ;;  %vm585_vm2 = vcmp.eq.f32.partialorder %v1659_v55, %v215_v52  ;;  %v262_v50 = vsub.f32 %v1659_v55, %v215_v52 }
 0x11e   :  { %vm593_vm3 = vcmp.eq.f32.partialorder %v1662_v56, %v231_v51  ;;  %v1807_v18 = vsel %vm585_vm2, %v1778_v53, 128  ;;  %v270_v42 = vsub.f32 %v1662_v56, %v231_v51 }
 0x11f   :  { %v1801_v12 = vsel %vm593_vm3, %v1778_v53, 128  ;;  %v858_v29 = vshra.s32 %v1807_v18, 16  ;;  %v310_v4 = vmul.f32 1.442695, %v262_v50 }
 0x120   :  { %v970_v13 = vshra.s32 %v1801_v12, 16  ;;  %v1804_v14 = vpop.eup %1343  ;;  %v326_v60 = vmul.f32 1.442695, %v270_v42 }
 0x121   :  { %342 = vadd.xlane.f32.xlu2 %v1804_v14  ;;  %v1812_v23 = vpop.eup %1345  ;;  %v1824_v36 = vcvt.s32.f32 %v858_v29 }
 0x122   :  { %v1810_v19 = vcvt.s32.f32 %v970_v13  ;;  %1347 = vpow2.f32 %v326_v60 }
 0x123   :  { %1349 = vpow2.f32 %v310_v4 }
 0x124   :  { %v233_v24 = vpop.xlane.xlu1 %232  ;;  %v217_v25 = vpop.xlane.xlu2 %216  ;;  %358 = vadd.xlane.f32.xlu1 %v1812_v23  ;;  %973 = vmin.xlane.f32.xlu0 %v1810_v19 }
 0x125   :  { %vm586_vm4 = vcmp.eq.f32.partialorder %v1670_v62, %v217_v25  ;;  %v185_v30 = vpop.xlane.xlu0 %184  ;;  %vm594_vm6 = vcmp.eq.f32.partialorder %v1673_v63, %v233_v24  ;;  %v263_v13 = vsub.f32 %v1670_v62, %v217_v25  ;;  %v271_v60 = vsub.f32 %v1673_v63, %v233_v24 }
 0x126   :  { %vm570_vm5 = vcmp.eq.f32.partialorder %v1667_v59, %v185_v30  ;;  %v1820_v31 = vsel %vm586_vm4, %v1778_v53, 128  ;;  %v1834_v43 = vsel %vm594_vm6, %v1778_v53, 128  ;;  %v247_v29 = vsub.f32 %v1667_v59, %v185_v30 }
 0x127   :  { %v872_v35 = vshra.s32 %v1820_v31, 16  ;;  %v1827_v37 = vsel %vm570_vm5, %v1778_v53, 128  ;;  %v984_v58 = vshra.s32 %v1834_v43, 16  ;;  %v328_v30 = vmul.f32 1.442695, %v271_v60 }
 0x128   :  { %v648_v47 = vshra.s32 %v1827_v37, 16  ;;  %v1862_v50 = vpop.eup %1347 }
 0x129   :  { %861 = vmin.xlane.f32.xlu2 %v1824_v36  ;;  %v1830_v41 = vcvt.s32.f32 %v872_v35  ;;  %v1849_v55 = vcvt.s32.f32 %v984_v58  ;;  %v280_v58 = vmul.f32 1.442695, %v247_v29 }
 0x12a   :  { %v1845_v56 = vcvt.s32.f32 %v648_v47  ;;  %v312_v47 = vmul.f32 1.442695, %v263_v13 }
 0x12c   :  { %875 = vmin.xlane.f32.xlu1 %v1830_v41  ;;  %v187_v54 = vpop.xlane.xlu1 %186  ;;  %v235_v62 = vpop.xlane.xlu2 %234 }
 0x12d   :  { %v201_v57 = vpop.xlane.xlu0 %200  ;;  %vm571_vm8 = vcmp.eq.f32.partialorder %v1679_v2, %v187_v54  ;;  %v248_v59 = vsub.f32 %v1679_v2, %v187_v54  ;;  %vm595_vm10 = vcmp.eq.f32.partialorder %v1685_v6, %v235_v62 }
 0x12e   :  { %vm578_vm7 = vcmp.eq.f32.partialorder %v1682_v3, %v201_v57  ;;  %v255_v52 = vsub.f32 %v1682_v3, %v201_v57  ;;  %v1855_v51 = vsel %vm571_vm8, %v1778_v53, 128  ;;  %v1867_v57 = vpop.eup %1349 }
 0x12f   :  { %v1842_v0 = vsel %vm578_vm7, %v1778_v53, 128  ;;  %v662_v35 = vshra.s32 %v1855_v51, 16  ;;  %v282_v4 = vmul.f32 1.442695, %v248_v59 }
 0x130   :  { %v760_v1 = vshra.s32 %v1842_v0, 16  ;;  %v296_v42 = vmul.f32 1.442695, %v255_v52 }
 0x131   :  { %651 = vmin.xlane.f32.xlu2 %v1845_v56  ;;  %v1865_v3 = vcvt.s32.f32 %v662_v35 }
 0x132   :  { %v1851_v5 = vcvt.s32.f32 %v760_v1  ;;  %1351 = vpow2.f32 %v296_v42 }
 0x133   :  { %1353 = vpow2.f32 %v312_v47  ;;  %v1893_v47 = vsel %vm595_vm10, %v1778_v53, 128 }
 0x134   :  { %987 = vmin.xlane.f32.xlu1 %v1849_v55  ;;  %763 = vmin.xlane.f32.xlu0 %v1851_v5  ;;  %v203_v25 = vpop.xlane.xlu1 %202  ;;  %1355 = vpow2.f32 %v280_v58  ;;  %v205_v24 = vpop.xlane.xlu2 %204 }
 0x135   :  { %vm579_vm9 = vcmp.eq.f32.partialorder %v1691_v9, %v203_v25  ;;  %1357 = vpow2.f32 %v328_v30  ;;  %v256_v54 = vsub.f32 %v1691_v9, %v203_v25  ;;  %vm580_vm11 = vcmp.eq.f32.partialorder %v1694_v10, %v205_v24  ;;  %v219_v29 = vpop.xlane.xlu0 %218 }
 0x136   :  { %v1877_v52 = vsel %vm579_vm9, %v1778_v53, 128  ;;  %1359 = vpow2.f32 %v282_v4  ;;  %v264_v59 = vsub.f32 %v1697_v11, %v219_v29  ;;  %v1902_v25 = vsel %vm580_vm11, %v1778_v53, 128 }
 0x137   :  { %2868 = vst [vmem:[#allocation2_spill] sm:$0xff] %v1877_v52  ;;  %v774_v2 = vshra.s32 %v1877_v52, 16  ;;  %v298_v42 = vmul.f32 1.442695, %v256_v54  ;;  %v998_v30 = vshra.s32 %v1893_v47, 16  ;;  %v272_v4 = vsub.f32 %v1685_v6, %v235_v62 }
 0x138   :  { %v1874_v1 = vpop.eup %1351  ;;  %2873 = vst [vmem:[#allocation7_spill] sm:$0xff] %v1902_v25  ;;  %v314_v54 = vmul.f32 1.442695, %v264_v59  ;;  %vm587_vm12 = vcmp.eq.f32.partialorder %v1697_v11, %v219_v29  ;;  %v257_v11 = vsub.f32 %v1694_v10, %v205_v24 }
 0x139   :  { %390 = vadd.xlane.f32.xlu2 %v1862_v50  ;;  %v1879_v13 = vpop.eup %1353  ;;  %v1890_v35 = vcvt.s32.f32 %v774_v2  ;;  %1361 = vpow2.f32 %v298_v42  ;;  %v788_v2 = vshra.s32 %v1902_v25, 16  ;;  %v1919_v6 = vsel %vm587_vm12, %v1778_v53, 128 }
 0x13a   :  { %2869 = vst [vmem:[#allocation3_spill] sm:$0xff] %v1879_v13  ;;  %v1882_v63 = vpop.eup %1355  ;;  %1363 = vpow2.f32 %v314_v54  ;;  %v886_v29 = vshra.s32 %v1919_v6, 16 }
 0x13b   :  { %2870 = vst [vmem:[#allocation4_spill] sm:$0xff] %v1890_v35  ;;  %v1895_v58 = vpop.eup %1357  ;;  %v1913_v52 = vcvt.s32.f32 %v788_v2 }
 0x13c   :  { %665 = vmin.xlane.f32.xlu1 %v1865_v3  ;;  %374 = vadd.xlane.f32.xlu0 %v1867_v57  ;;  %2871 = vst [vmem:[#allocation5_spill] sm:$0xff] %v1895_v58  ;;  %v1898_v60 = vpop.eup %1359  ;;  %v189_v9 = vpop.xlane.xlu1 %188  ;;  %v1931_v2 = vcvt.s32.f32 %v886_v29 }
 0x13d   :  { %2872 = vst [vmem:[#allocation6_spill] sm:$0xff] %v1898_v60  ;;  %vm572_vm13 = vcmp.eq.f32.partialorder %v1703_v15, %v189_v9  ;;  %v237_v24 = vpop.xlane.xlu0 %236 }
 0x13e   :  { %2874 = vst [vmem:[#allocation8_spill] sm:$0xff] %v1913_v52  ;;  %v1936_v10 = vsel %vm572_vm13, %v1778_v53, 128  ;;  %vm596_vm15 = vcmp.eq.f32.partialorder %v1709_v17, %v237_v24 }
 0x13f   :  { %2876 = vst [vmem:[#allocation10_spill] sm:$0xff] %v1919_v6 }
 0x140   :  { %2878 = vst [vmem:[#allocation12_spill] sm:$0xff] %v1931_v2 }
 0x141   :  { %360 = vadd.xlane.f32.xlu2 %v1874_v1 }
 0x144   :  { %376 = vadd.xlane.f32.xlu1 %v1879_v13  ;;  %344 = vadd.xlane.f32.xlu0 %v1882_v63  ;;  %v1910_v13 = vcvt.s32.f32 %v998_v30  ;;  %v221_v62 = vpop.xlane.xlu1 %220  ;;  %v300_v30 = vmul.f32 1.442695, %v257_v11 }
 0x145   :  { %vm588_vm0 = vcmp.eq.f32.partialorder %v1715_v20, %v221_v62 }
 0x149   :  { %777 = vmin.xlane.f32.xlu2 %v1890_v35  ;;  %v330_v35 = vmul.f32 1.442695, %v272_v4  ;;  %v1928_v4 = vpop.xlane.xlu2 %190 }
 0x14a   :  { %vm573_vm14 = vcmp.eq.f32.partialorder %v1706_v16, %v1928_v4 }
 0x14b   :  { %1365 = vpow2.f32 %v330_v35 }
 0x14c   :  { %346 = vadd.xlane.f32.xlu1 %v1898_v60  ;;  %392 = vadd.xlane.f32.xlu0 %v1895_v58  ;;  %v1915_v60 = vpop.eup %1361  ;;  %v249_v58 = vsub.f32 %v1703_v15, %v189_v9  ;;  %v676_v15 = vshra.s32 %v1936_v10, 16  ;;  %v1943_v35 = vpop.xlane.xlu1 %238  ;;  %v1950_v9 = vsel %vm573_vm14, %v1778_v53, 128 }
 0x14d   :  { %2875 = vst [vmem:[#allocation9_spill] sm:$0xff] %v1915_v60  ;;  %v1926_v59 = vpop.eup %1363  ;;  %vm597_vm2 = vcmp.eq.f32.partialorder %v1730_v27, %v1943_v35 }
 0x14e   :  { %v284_v42 = vmul.f32 1.442695, %v249_v58  ;;  %2877 = vst [vmem:[#allocation11_spill] sm:$0xff] %v1926_v59  ;;  %v1953_v11 = vcvt.s32.f32 %v676_v15 }
 0x14f   :  { %2881 = vst [vmem:[#allocation15_spill] sm:$0xff] %v1950_v9 }
 0x150   :  { %1367 = vpow2.f32 %v284_v42  ;;  %v273_v42 = vsub.f32 %v1709_v17, %v237_v24 }
 0x151   :  { %1001 = vmin.xlane.f32.xlu2 %v1910_v13  ;;  %v1933_v54 = vpop.eup %1365  ;;  %1369 = vpow2.f32 %v300_v30  ;;  %v1959_v30 = vsel %vm596_vm15, %v1778_v53, 128 }
 0x152   :  { %2879 = vst [vmem:[#allocation13_spill] sm:$0xff] %v1933_v54  ;;  %v332_v25 = vmul.f32 1.442695, %v273_v42 }
 0x153   :  { %2883 = vst [vmem:[#allocation17_spill] sm:$0xff] %v1959_v30 }
 0x154   :  { %791 = vmin.xlane.f32.xlu1 %v1913_v52  ;;  %362 = vadd.xlane.f32.xlu0 %v1915_v60  ;;  %v1962_v60 = vsel %vm588_vm0, %v1778_v53, 128  ;;  %v1012_v52 = vshra.s32 %v1959_v30, 16  ;;  %v1974_v24 = vpop.xlane.xlu1 %208  ;;  %1371 = vpow2.f32 %v332_v25  ;;  %v1986_v30 = vsel %vm597_vm2, %v1778_v53, 128 }
 0x155   :  { %2884 = vst [vmem:[#allocation18_spill] sm:$0xff] %v1962_v60  ;;  %v900_v15 = vshra.s32 %v1962_v60, 16  ;;  %vm582_vm5 = vcmp.eq.f32.partialorder %v1739_v32, %v1974_v24 }
 0x156   :  { %v1947_v58 = vpop.eup %1367 }
 0x157   :  { %2880 = vst [vmem:[#allocation14_spill] sm:$0xff] %v1947_v58  ;;  %v1955_v29 = vpop.eup %1369 }
 0x158   :  { %2882 = vst [vmem:[#allocation16_spill] sm:$0xff] %v1955_v29 }
 0x159   :  { %378 = vadd.xlane.f32.xlu2 %v1926_v59  ;;  %v690_v59 = vshra.s32 %v1950_v9, 16  ;;  %v1979_v9 = vcvt.s32.f32 %v1012_v52 }
 0x15b   :  { %v1972_v17 = vcvt.s32.f32 %v690_v59  ;;  %2887 = vst [vmem:[#allocation21_spill] sm:$0xff] %v1979_v9  ;;  %v265_v59 = vsub.f32 %v1715_v20, %v221_v62 }
 0x15c   :  { %394 = vadd.xlane.f32.xlu1 %v1933_v54  ;;  %889 = vmin.xlane.f32.xlu0 %v1931_v2  ;;  %v223_v54 = vpop.xlane.xlu2 %222  ;;  %v2006_v62 = vpop.xlane.xlu1 %226 }
 0x15d   :  { %2885 = vst [vmem:[#allocation19_spill] sm:$0xff] %v1972_v17  ;;  %vm589_vm4 = vcmp.eq.f32.partialorder %v1718_v21, %v223_v54  ;;  %vm591_vm11 = vcmp.eq.f32.partialorder %v1754_v39, %v2006_v62 }
 0x161   :  { %348 = vadd.xlane.f32.xlu2 %v1947_v58  ;;  %v207_v58 = vpop.xlane.xlu0 %206 }
 0x162   :  { %vm581_vm1 = vcmp.eq.f32.partialorder %v1721_v22, %v207_v58  ;;  %v258_v60 = vsub.f32 %v1721_v22, %v207_v58  ;;  %v1996_v22 = vpop.eup %1371  ;;  %v316_v58 = vmul.f32 1.442695, %v265_v59  ;;  %v266_v59 = vsub.f32 %v1718_v21, %v223_v54 }
 0x163   :  { %v1983_v42 = vsel %vm581_vm1, %v1778_v53, 128  ;;  %2889 = vst [vmem:[#allocation23_spill] sm:$0xff] %v1996_v22 }
 0x164   :  { %364 = vadd.xlane.f32.xlu1 %v1955_v29  ;;  %679 = vmin.xlane.f32.xlu0 %v1953_v11  ;;  %v1977_v29 = vcvt.s32.f32 %v900_v15  ;;  %2888 = vst [vmem:[#allocation22_spill] sm:$0xff] %v1983_v42  ;;  %v1026_v15 = vshra.s32 %v1986_v30, 16  ;;  %v802_v52 = vshra.s32 %v1983_v42, 16  ;;  %v302_v25 = vmul.f32 1.442695, %v258_v60 }
 0x165   :  { %v250_v60 = vsub.f32 %v1706_v16, %v1928_v4  ;;  %v2018_v42 = vsel %vm589_vm4, %v1778_v53, 128 }
 0x166   :  { %2886 = vst [vmem:[#allocation20_spill] sm:$0xff] %v1977_v29  ;;  %1373 = vpow2.f32 %v302_v25  ;;  %v914_v54 = vshra.s32 %v2018_v42, 16 }
 0x167   :  { %1375 = vpow2.f32 %v316_v58  ;;  %2893 = vst [vmem:[#allocation27_spill] sm:$0xff] %v2018_v42  ;;  %v274_v58 = vsub.f32 %v1730_v27, %v1943_v35 }
 0x169   :  { %693 = vmin.xlane.f32.xlu2 %v1972_v17  ;;  %v193_v17 = vpop.xlane.xlu2 %192  ;;  %v1993_v2 = vpop.xlane.xlu0 %224 }
 0x16a   :  { %vm574_vm3 = vcmp.eq.f32.partialorder %v1727_v26, %v193_v17  ;;  %v251_v21 = vsub.f32 %v1727_v26, %v193_v17  ;;  %v2040_v26 = vsel %vm582_vm5, %v1778_v53, 128  ;;  %vm590_vm8 = vcmp.eq.f32.partialorder %v1733_v28, %v1993_v2 }
 0x16b   :  { %v2004_v20 = vsel %vm574_vm3, %v1778_v53, 128  ;;  %2897 = vst [vmem:[#allocation31_spill] sm:$0xff] %v2040_v26  ;;  %v816_v35 = vshra.s32 %v2040_v26, 16 }
 0x16c   :  { %903 = vmin.xlane.f32.xlu1 %v1977_v29  ;;  %1015 = vmin.xlane.f32.xlu0 %v1979_v9  ;;  %v1999_v29 = vcvt.s32.f32 %v1026_v15  ;;  %v2001_v9 = vcvt.s32.f32 %v802_v52  ;;  %2891 = vst [vmem:[#allocation25_spill] sm:$0xff] %v2004_v20  ;;  %v704_v15 = vshra.s32 %v2004_v20, 16  ;;  %v286_v52 = vmul.f32 1.442695, %v250_v60  ;;  %v2015_v25 = vpop.eup %1373  ;;  %v2033_v60 = vpop.xlane.xlu1 %196 }
 0x16d   :  { %2892 = vst [vmem:[#allocation26_spill] sm:$0xff] %v2015_v25  ;;  %vm576_vm10 = vcmp.eq.f32.partialorder %v1763_v44, %v2033_v60 }
 0x16e   :  { %2890 = vst [vmem:[#allocation24_spill] sm:$0xff] %v2001_v9  ;;  %v2023_v4 = vcvt.s32.f32 %v704_v15  ;;  %1377 = vpow2.f32 %v286_v52  ;;  %v2037_v15 = vcvt.s32.f32 %v914_v54  ;;  %v334_v52 = vmul.f32 1.442695, %v274_v58 }
 0x16f   :  { %v2058_v58 = vcvt.s32.f32 %v816_v35 }
 0x170   :  { %2894 = vst [vmem:[#allocation28_spill] sm:$0xff] %v2023_v4 }
 0x171   :  { %396 = vadd.xlane.f32.xlu2 %v1996_v22  ;;  %v318_v22 = vmul.f32 1.442695, %v266_v59  ;;  %v241_v6 = vpop.xlane.xlu2 %240  ;;  %v2020_v16 = vpop.xlane.xlu0 %194  ;;  %v288_v59 = vmul.f32 1.442695, %v251_v21  ;;  %2896 = vst [vmem:[#allocation30_spill] sm:$0xff] %v2037_v15  ;;  %v259_v21 = vsub.f32 %v1739_v32, %v1974_v24  ;;  %v267_v32 = vsub.f32 %v1733_v28, %v1993_v2 }
 0x172   :  { %vm598_vm6 = vcmp.eq.f32.partialorder %v1742_v33, %v241_v6  ;;  %2900 = vst [vmem:[#allocation34_spill] sm:$0xff] %v2058_v58  ;;  %vm575_vm9 = vcmp.eq.f32.partialorder %v1745_v34, %v2020_v16 }
 0x173   :  { %1379 = vpow2.f32 %v318_v22 }
 0x174   :  { %1029 = vmin.xlane.f32.xlu1 %v1999_v29  ;;  %805 = vmin.xlane.f32.xlu0 %v2001_v9  ;;  %v2025_v9 = vpop.eup %1375  ;;  %1381 = vpow2.f32 %v288_v59  ;;  %v2055_v54 = vpop.xlane.xlu1 %244  ;;  %v2061_v59 = vsel %vm598_vm6, %v1778_v53, 128 }
 0x175   :  { %2895 = vst [vmem:[#allocation29_spill] sm:$0xff] %v2025_v9  ;;  %v2042_v17 = vpop.eup %1377  ;;  %1383 = vpow2.f32 %v334_v52  ;;  %v1040_v35 = vshra.s32 %v2061_v59, 16  ;;  %vm600_vm14 = vcmp.eq.f32.partialorder %v1775_v49, %v2055_v54 }
 0x176   :  { %2898 = vst [vmem:[#allocation32_spill] sm:$0xff] %v2042_v17 }
 0x179   :  { %366 = vadd.xlane.f32.xlu2 %v2015_v25  ;;  %v2045_v22 = vpop.eup %1379  ;;  %v2047_v27 = vpop.xlane.xlu0 %242 }
 0x17a   :  { %2899 = vst [vmem:[#allocation33_spill] sm:$0xff] %v2045_v22  ;;  %v2063_v25 = vpop.eup %1381  ;;  %vm599_vm12 = vcmp.eq.f32.partialorder %v1757_v40, %v2047_v27 }
 0x17b   :  { %2901 = vst [vmem:[#allocation35_spill] sm:$0xff] %v2063_v25  ;;  %v2066_v52 = vpop.eup %1383 }
 0x17c   :  { %707 = vmin.xlane.f32.xlu1 %v2023_v4  ;;  %380 = vadd.xlane.f32.xlu0 %v2025_v9  ;;  %v211_v9 = vpop.xlane.xlu2 %210  ;;  %2902 = vst [vmem:[#allocation36_spill] sm:$0xff] %v2066_v52  ;;  %v320_v4 = vmul.f32 1.442695, %v267_v32 }
 0x17d   :  { %vm583_vm7 = vcmp.eq.f32.partialorder %v1751_v38, %v211_v9  ;;  %v260_v28 = vsub.f32 %v1751_v38, %v211_v9  ;;  %v2118_v9 = vsel %vm575_vm9, %v1778_v53, 128 }
 0x17e   :  { %v2071_v24 = vsel %vm583_vm7, %v1778_v53, 128  ;;  %2911 = vst [vmem:[#allocation45_spill] sm:$0xff] %v2118_v9 }
 0x17f   :  { %2903 = vst [vmem:[#allocation37_spill] sm:$0xff] %v2071_v24  ;;  %v830_v26 = vshra.s32 %v2071_v24, 16  ;;  %v276_v24 = vsub.f32 %v1757_v40, %v2047_v27 }
 0x181   :  { %917 = vmin.xlane.f32.xlu2 %v2037_v15  ;;  %v2089_v15 = vcvt.s32.f32 %v830_v26  ;;  %v338_v42 = vmul.f32 1.442695, %v276_v24 }
 0x183   :  { %2905 = vst [vmem:[#allocation39_spill] sm:$0xff] %v2089_v15 }
 0x184   :  { %382 = vadd.xlane.f32.xlu1 %v2045_v22  ;;  %350 = vadd.xlane.f32.xlu0 %v2042_v17  ;;  %v304_v22 = vmul.f32 1.442695, %v259_v21  ;;  %v275_v21 = vsub.f32 %v1742_v33, %v241_v6  ;;  %v2077_v17 = vpop.xlane.xlu2 %228  ;;  %v2094_v6 = vsel %vm590_vm8, %v1778_v53, 128 }
 0x185   :  { %2907 = vst [vmem:[#allocation41_spill] sm:$0xff] %v2094_v6  ;;  %v928_v32 = vshra.s32 %v2094_v6, 16  ;;  %vm592_vm0 = vcmp.eq.f32.partialorder %v1766_v45, %v2077_v17 }
 0x186   :  { %1385 = vpow2.f32 %v304_v22  ;;  %v252_v22 = vsub.f32 %v1745_v34, %v2020_v16  ;;  %v718_v34 = vshra.s32 %v2118_v9, 16 }
 0x187   :  { %1387 = vpow2.f32 %v320_v4 }
 0x188   :  { %v290_v4 = vmul.f32 1.442695, %v252_v22 }
 0x189   :  { %819 = vmin.xlane.f32.xlu2 %v2058_v58  ;;  %v2079_v58 = vpop.xlane.xlu0 %212 }
 0x18a   :  { %vm584_vm13 = vcmp.eq.f32.partialorder %v1769_v46, %v2079_v58 }
 0x18c   :  { %352 = vadd.xlane.f32.xlu1 %v2063_v25  ;;  %398 = vadd.xlane.f32.xlu0 %v2066_v52  ;;  %v2086_v25 = vcvt.s32.f32 %v1040_v35  ;;  %v336_v52 = vmul.f32 1.442695, %v275_v21  ;;  %v2091_v33 = vpop.eup %1385 }
 0x18d   :  { %2906 = vst [vmem:[#allocation40_spill] sm:$0xff] %v2091_v33  ;;  %v2110_v21 = vpop.eup %1387 }
 0x18e   :  { %2904 = vst [vmem:[#allocation38_spill] sm:$0xff] %v2086_v25  ;;  %1389 = vpow2.f32 %v336_v52  ;;  %v2113_v52 = vcvt.s32.f32 %v928_v32 }
 0x18f   :  { %v2082_v20 = vpop.xlane.xlu1 %749  ;;  %2908 = vst [vmem:[#allocation42_spill] sm:$0xff] %v2110_v21  ;;  %1391 = vpow2.f32 %v290_v4  ;;  %v2141_v4 = vcvt.s32.f32 %v718_v34  ;;  %v983_v34 = vand.u32 65535, %v1834_v43 }
 0x190   :  { %2909 = vst [vmem:[#allocation43_spill] sm:$0xff] %v2113_v52  ;;  %vm751_vm2 = vcmp.eq.f32.partialorder %v1792_v7, %v2082_v20 }
 0x191   :  { %1043 = vmin.xlane.f32.xlu2 %v2086_v25  ;;  %v2101_v2 = vpop.xlane.xlu0 %637  ;;  %2914 = vst [vmem:[#allocation48_spill] sm:$0xff] %v2141_v4  ;;  %v985_v43 = vcvt.s32.f32 %v983_v34 }
 0x192   :  { %vm639_vm1 = vcmp.eq.f32.partialorder %v1794_v8, %v2101_v2 }
 0x194   :  { %833 = vmin.xlane.f32.xlu1 %v2089_v15  ;;  %368 = vadd.xlane.f32.xlu0 %v2091_v33  ;;  %v2103_v26 = vpop.xlane.xlu2 %342  ;;  %v306_v15 = vmul.f32 1.442695, %v260_v28  ;;  %v2115_v38 = vpop.eup %1389  ;;  %v2146_v33 = vsel %vm591_vm11, %v1778_v53, 128 }
 0x195   :  { %2910 = vst [vmem:[#allocation44_spill] sm:$0xff] %v2115_v38  ;;  %v2135_v32 = vpop.eup %1391  ;;  %v942_v6 = vshra.s32 %v2146_v33, 16 }
 0x196   :  { %1393 = vpow2.f32 %v306_v15  ;;  %2912 = vst [vmem:[#allocation46_spill] sm:$0xff] %v2135_v32  ;;  %v2138_v15 = vsel %vm576_vm10, %v1778_v53, 128 }
 0x197   :  { %v2106_v35 = vpop.xlane.xlu1 %358  ;;  %2913 = vst [vmem:[#allocation47_spill] sm:$0xff] %v2138_v15  ;;  %1395 = vpow2.f32 %v338_v42 }
 0x198   :  { %2916 = vst [vmem:[#allocation50_spill] sm:$0xff] %v2146_v33  ;;  %v261_v33 = vsub.f32 %v1769_v46, %v2079_v58 }
 0x199   :  { %384 = vadd.xlane.f32.xlu2 %v2110_v21  ;;  %v2127_v16 = vpop.xlane.xlu0 %973  ;;  %v2151_v21 = vsel %vm599_vm12, %v1778_v53, 128 }
 0x19a   :  { %v1054_v9 = vshra.s32 %v2151_v21, 16  ;;  %vm975_vm4 = vcmp.eq.f32.partialorder %v1810_v19, %v2127_v16  ;;  %v871_v19 = vand.u32 65535, %v1820_v31 }
 0x19c   :  { %400 = vadd.xlane.f32.xlu1 %v2115_v38  ;;  %931 = vmin.xlane.f32.xlu0 %v2113_v52  ;;  %v2122_v22 = vpop.xlane.xlu2 %861  ;;  %v2143_v38 = vpop.eup %1393  ;;  %v732_v52 = vshra.s32 %v2138_v15, 16  ;;  %v2176_v24 = vcvt.s32.f32 %v1054_v9  ;;  %v308_v9 = vmul.f32 1.442695, %v261_v33  ;;  %v253_v33 = vsub.f32 %v1763_v44, %v2033_v60 }
 0x19d   :  { %2915 = vst [vmem:[#allocation49_spill] sm:$0xff] %v2143_v38  ;;  %vm863_vm5 = vcmp.eq.f32.partialorder %v1824_v36, %v2122_v22 }
 0x19e   :  { %v2169_v27 = vcvt.s32.f32 %v732_v52  ;;  %v2186_v52 = vsel %vm600_vm14, %v1778_v53, 128  ;;  %1397 = vpow2.f32 %v308_v9  ;;  %v292_v9 = vmul.f32 1.442695, %v253_v33 }
 0x19f   :  { %v2129_v28 = vpop.xlane.xlu1 %875  ;;  %v1068_v46 = vshra.s32 %v2186_v52, 16 }
 0x1a0   :  { %2918 = vst [vmem:[#allocation52_spill] sm:$0xff] %v2169_v27  ;;  %vm877_vm6 = vcmp.eq.f32.partialorder %v1830_v41, %v2129_v28  ;;  %v661_v41 = vand.u32 65535, %v1855_v51 }
 0x1a1   :  { %354 = vadd.xlane.f32.xlu2 %v2135_v32 }
 0x1a4   :  { %370 = vadd.xlane.f32.xlu1 %v2143_v38  ;;  %721 = vmin.xlane.f32.xlu0 %v2141_v4  ;;  %v2157_v32 = vpop.xlane.xlu2 %651  ;;  %v2174_v38 = vcvt.s32.f32 %v942_v6  ;;  %v2183_v4 = vsel %vm584_vm13, %v1778_v53, 128  ;;  %v269_v6 = vsub.f32 %v1766_v45, %v2077_v17 }
 0x1a5   :  { %v844_v58 = vshra.s32 %v2183_v4, 16  ;;  %vm653_vm7 = vcmp.eq.f32.partialorder %v1845_v56, %v2157_v32 }
 0x1a6   :  { %2919 = vst [vmem:[#allocation53_spill] sm:$0xff] %v2174_v38 }
 0x1a7   :  { %v2161_v25 = vpop.xlane.xlu1 %987  ;;  %v2163_v40 = vpop.xlane.xlu0 %763 }
 0x1a8   :  { %2917 = vst [vmem:[#allocation51_spill] sm:$0xff] %v2161_v25  ;;  %vm989_vm15 = vcmp.eq.f32.partialorder %v1849_v55, %v2161_v25  ;;  %v268_v55 = vsub.f32 %v1754_v39, %v2006_v62  ;;  %v2202_v39 = vpop.eup %1395  ;;  %v324_v62 = vmul.f32 1.442695, %v269_v6  ;;  %vm765_vm3 = vcmp.eq.f32.partialorder %v1851_v5, %v2163_v40 }
 0x1a9   :  { %735 = vmin.xlane.f32.xlu2 %v2169_v27  ;;  %v2178_v15 = vsel %vm989_vm15, %v985_v43, inf  ;;  %2920 = vst [vmem:[#allocation54_spill] sm:$0xff] %v2202_v39  ;;  %v2205_v27 = vcvt.s32.f32 %v1068_v46 }
 0x1aa   :  { %v322_v25 = vmul.f32 1.442695, %v268_v55 }
 0x1ac   :  { %945 = vmin.xlane.f32.xlu1 %v2174_v38  ;;  %1057 = vmin.xlane.f32.xlu0 %v2176_v24  ;;  %v2194_v42 = vpop.xlane.xlu2 %390  ;;  %v2207_v38 = vcvt.s32.f32 %v844_v58  ;;  %1399 = vpow2.f32 %v322_v25  ;;  %v2220_v58 = vpop.eup %1397  ;;  %v2223_v25 = vsel %vm592_vm0, %v1778_v53, 128  ;;  %v277_v53 = vsub.f32 %v1775_v49, %v2055_v54 }
 0x1ad   :  { %1401 = vpow2.f32 %v324_v62  ;;  %2921 = vst [vmem:[#allocation55_spill] sm:$0xff] %v2220_v58  ;;  %v956_v45 = vshra.s32 %v2223_v25, 16 }
 0x1ae   :  { %1403 = vrcp.f32 %v2103_v26  ;;  %2922 = vst [vmem:[#allocation56_spill] sm:$0xff] %v2223_v25  ;;  %v633_v26 = vand.u32 65535, %v1788_v48  ;;  %v340_v49 = vmul.f32 1.442695, %v277_v53 }
 0x1af   :  { %v2198_v34 = vpop.xlane.xlu1 %665  ;;  %v2200_v43 = vpop.xlane.xlu0 %374 }
 0x1b0   :  { %v635_v54 = vcvt.s32.f32 %v633_v26  ;;  %vm667_vm8 = vcmp.eq.f32.partialorder %v1865_v3, %v2198_v34 }
 0x1b1   :  { %402 = vadd.xlane.f32.xlu2 %v2202_v39  ;;  %v2242_v39 = vcvt.s32.f32 %v956_v45  ;;  %v745_v45 = vand.u32 65535, %v1785_v61 }
 0x1b2   :  { %v2225_v62 = vpop.eup %1399  ;;  %v640_v25 = vsel %vm639_vm1, %v635_v54, inf }
 0x1b3   :  { %2923 = vst [vmem:[#allocation57_spill] sm:$0xff] %v2225_v62  ;;  %v2228_v44 = vpop.eup %1401 }
 0x1b4   :  { %1071 = vmin.xlane.f32.xlu1 %v2205_v27  ;;  %847 = vmin.xlane.f32.xlu0 %v2207_v38  ;;  %v2213_v55 = vpop.xlane.xlu2 %360  ;;  %2924 = vst [vmem:[#allocation58_spill] sm:$0xff] %v2228_v44  ;;  %v1404_v60 = vpop.eup %1403 }
 0x1b5   :  { %2925 = vst [vmem:[#allocation59_spill] sm:$0xff] %v2242_v39 }
 0x1b7   :  { %v2218_v6 = vpop.xlane.xlu1 %376  ;;  %v345_v46 = vpop.xlane.xlu0 %344 }
 0x1b8   :  { %1405 = vrcp.f32 %v345_v46 }
 0x1b9   :  { %372 = vadd.xlane.f32.xlu2 %v2220_v58  ;;  %1407 = vpow2.f32 %v292_v9 }
 0x1ba   :  { %1409 = vpow2.f32 %v340_v49 }
 0x1bb   :  { %1411 = vrcp.f32 %v2194_v42  ;;  %v873_v42 = vcvt.s32.f32 %v871_v19 }
 0x1bc   :  { %388 = vadd.xlane.f32.xlu1 %v2228_v44  ;;  %386 = vadd.xlane.f32.xlu0 %v2225_v62  ;;  %v2235_v17 = vpop.xlane.xlu2 %777  ;;  %v438_v44 = vmul.f32 %v1404_v60, %v1804_v14  ;;  %1413 = vrcp.f32 %v2106_v35 }
 0x1bd   :  { %1415 = vrcp.f32 %v2213_v55  ;;  %v878_v31 = vsel %vm877_vm6, %v873_v42, inf }
 0x1be   :  { %v1406_v33 = vpop.eup %1405  ;;  %1417 = vrcp.f32 %v2200_v43  ;;  %v997_v43 = vand.u32 65535, %v1893_v47 }
 0x1bf   :  { %v2238_v46 = vpop.xlane.xlu1 %346  ;;  %v2240_v58 = vpop.xlane.xlu0 %392  ;;  %v2248_v9 = vmul.f32 %v1406_v33, %v1882_v63  ;;  %v759_v63 = vand.u32 65535, %v1842_v0  ;;  %v747_v33 = vcvt.s32.f32 %v745_v45  ;;  %v857_v45 = vand.u32 65535, %v1807_v18 }
 0x1c0   :  { %v2252_v62 = vpop.eup %1407  ;;  %1419 = vrcp.f32 %v2218_v6 }
 0x1c1   :  { %959 = vmin.xlane.f32.xlu2 %v2242_v39  ;;  %v1244_v48 = vadd.f32 %v2248_v9, %v438_v44  ;;  %2926 = vst [vmem:[#allocation60_spill] sm:$0xff] %v2252_v62  ;;  %v761_v54 = vcvt.s32.f32 %v759_v63  ;;  %v969_v39 = vand.u32 65535, %v1801_v12  ;;  %v859_v18 = vcvt.s32.f32 %v857_v45 }
 0x1c2   :  { %v663_v45 = vcvt.s32.f32 %v661_v41  ;;  %v2929_v41 = vld [vmem:[#allocation10_spill] sm:$0xff]  ;;  %1421 = vrcp.f32 %v2238_v46  ;;  %v2935_v46 = vld [vmem:[#allocation8_spill] sm:$0xff] }
 0x1c3   :  { %v1275_v8 = vrot.slane %v1244_v48, 4  ;;  %v766_v0 = vsel %vm765_vm3, %v761_v54, inf }
 0x1c4   :  { %356 = vadd.xlane.f32.xlu0 %v2252_v62  ;;  %641 = vmin.xlane.f32.xlu1 %v640_v25  ;;  %v2256_v14 = vpop.xlane.xlu2 %1001  ;;  %v752_v25 = vsel %vm751_vm2, %v747_v33, inf  ;;  %v2267_v62 = vpop.eup %1409  ;;  %v864_v33 = vsel %vm863_vm5, %v859_v18, inf }
 0x1c5   :  { %v1276_v60 = vadd.f32 %v1275_v8, %v1244_v48  ;;  %v1412_v36 = vpop.eup %1411  ;;  %vm1003_vm9 = vcmp.eq.f32.partialorder %v1910_v13, %v2256_v14 }
 0x1c7   :  { %v2261_v53 = vpop.xlane.xlu1 %791  ;;  %v2263_v26 = vpop.xlane.xlu0 %362  ;;  %v1277_v61 = vrot.slane %v1276_v60, 2 }
 0x1c8   :  { %vm793_vm15 = vcmp.eq.f32.partialorder %v2935_v46, %v2261_v53 }
 0x1c9   :  { %753 = vmin.xlane.f32.xlu2 %v752_v25  ;;  %v1278_v49 = vadd.f32 %v1277_v61, %v1276_v60  ;;  %v971_v60 = vcvt.s32.f32 %v969_v39  ;;  %v647_v39 = vand.u32 65535, %v1827_v37  ;;  %v462_v37 = vmul.f32 %v1412_v36, %v1862_v50  ;;  %v2927_v36 = vld [vmem:[#allocation2_spill] sm:$0xff] }
 0x1ca   :  { %v668_v50 = vsel %vm667_vm8, %v663_v45, inf  ;;  %v773_v42 = vand.u32 65535, %v2927_v36 }
 0x1cb   :  { %v1279_v7 = vrot.slane %v1278_v49, 1  ;;  %v976_v12 = vsel %vm975_vm4, %v971_v60, inf  ;;  %v1025_v60 = vand.u32 65535, %v1986_v30 }
 0x1cc   :  { %404 = vadd.xlane.f32.xlu0 %v2267_v62  ;;  %767 = vmin.xlane.f32.xlu1 %v766_v0  ;;  %v2271_v48 = vpop.xlane.xlu2 %378 }
 0x1cd   :  { %v1280_v5 = vadd.f32 %v1279_v7, %v1278_v49  ;;  %v1414_v7 = vpop.eup %1413  ;;  %v1027_v19 = vcvt.s32.f32 %v1025_v60  ;;  %1423 = vrcp.f32 %v2271_v48 }
 0x1ce   :  { %v1416_v35 = vpop.eup %1415  ;;  %v446_v51 = vmul.f32 %v1414_v7, %v1812_v23  ;;  %v999_v23 = vcvt.s32.f32 %v997_v43  ;;  %v2933_v43 = vld [vmem:[#allocation3_spill] sm:$0xff]  ;;  %1425 = vrcp.f32 %v2240_v58  ;;  %v2938_v58 = vld [vmem:[#allocation18_spill] sm:$0xff] }
 0x1cf   :  { %v2276_v8 = vpop.xlane.xlu1 %394  ;;  %v2278_v63 = vpop.xlane.xlu0 %889  ;;  %1281 = vst [vmem:[%s2806_s5] sm:$0xff] %v1280_v5  ;;  %v447_v5 = vmul.f32 %v1416_v35, %v1874_v1  ;;  %v2930_v35 = vld [vmem:[#allocation22_spill] sm:$0xff] }
 0x1d0   :  { %v1004_v30 = vsel %vm1003_vm9, %v999_v23, inf  ;;  %v801_v45 = vand.u32 65535, %v2930_v35  ;;  %v2934_v23 = vld [vmem:[#allocation7_spill] sm:$0xff] }
 0x1d1   :  { %977 = vmin.xlane.f32.xlu2 %v976_v12  ;;  %v1418_v12 = vpop.eup %1417 }
 0x1d4   :  { %865 = vmin.xlane.f32.xlu0 %v864_v33  ;;  %470 = vmax.xlane.f32.xlu1 %v438_v44  ;;  %v2287_v61 = vpop.xlane.xlu2 %348  ;;  %v649_v44 = vcvt.s32.f32 %v647_v39  ;;  %v454_v39 = vmul.f32 %v1418_v12, %v1867_v57  ;;  %v675_v57 = vand.u32 65535, %v1936_v10  ;;  %v885_v10 = vand.u32 65535, %v2929_v41 }
 0x1d5   :  { %v803_v12 = vcvt.s32.f32 %v801_v45  ;;  %1427 = vrcp.f32 %v2287_v61 }
 0x1d6   :  { %v654_v49 = vsel %vm653_vm7, %v649_v44, inf  ;;  %v677_v44 = vcvt.s32.f32 %v675_v57  ;;  %1429 = vrcp.f32 %v2263_v26 }
 0x1d7   :  { %v2292_v25 = vpop.xlane.xlu1 %364  ;;  %v2294_v54 = vpop.xlane.xlu0 %679  ;;  %1431 = vrcp.f32 %v2276_v8 }
 0x1d8   :  { %vm681_vm12 = vcmp.eq.f32.partialorder %v1953_v11, %v2294_v54  ;;  %v1420_v11 = vpop.eup %1419 }
 0x1d9   :  { %879 = vmin.xlane.f32.xlu2 %v878_v31 }
 0x1dc   :  { %655 = vmin.xlane.f32.xlu0 %v654_v49  ;;  %518 = vmax.xlane.f32.xlu1 %v462_v37  ;;  %v2302_v0 = vpop.xlane.xlu2 %693  ;;  %v682_v49 = vsel %vm681_vm12, %v677_v44, inf  ;;  %v1039_v44 = vand.u32 65535, %v2061_v59  ;;  %vm534_vm12 = vcmask 7168  }
 0x1df   :  { %v2307_v56 = vpop.xlane.xlu1 %903  ;;  %v2309_v55 = vpop.xlane.xlu0 %1015 }
 0x1e1   :  { %669 = vmin.xlane.f32.xlu2 %v668_v50  ;;  %v2931_v50 = vld [vmem:[#allocation12_spill] sm:$0xff] }
 0x1e2   :  { %vm891_vm13 = vcmp.eq.f32.partialorder %v2931_v50, %v2278_v63 }
 0x1e4   :  { %486 = vmax.xlane.f32.xlu0 %v446_v51  ;;  %488 = vmax.xlane.f32.xlu1 %v447_v5  ;;  %v2314_v3 = vpop.xlane.xlu2 %396  ;;  %v887_v5 = vcvt.s32.f32 %v885_v10  ;;  %v2937_v10 = vld [vmem:[#allocation11_spill] sm:$0xff] }
 0x1e5   :  { %1433 = vrcp.f32 %v2314_v3 }
 0x1e6   :  { %v892_v60 = vsel %vm891_vm13, %v887_v5, inf  ;;  %v1041_v5 = vcvt.s32.f32 %v1039_v44  ;;  %1435 = vrcp.f32 %v2292_v25 }
 0x1e7   :  { %v2317_v18 = vpop.xlane.xlu1 %1029  ;;  %v2319_v33 = vpop.xlane.xlu0 %805 }
 0x1e8   :  { %vm1031_vm10 = vcmp.eq.f32.partialorder %v1999_v29, %v2317_v18  ;;  %v2928_v29 = vld [vmem:[#allocation4_spill] sm:$0xff] }
 0x1e9   :  { %v2326_v1 = vsel %vm1031_vm10, %v1027_v19, inf  ;;  %502 = vmax.xlane.f32.xlu2 %v454_v39  ;;  %vm779_vm11 = vcmp.eq.f32.partialorder %v2928_v29, %v2235_v17  ;;  %v455_v19 = vmul.f32 %v1420_v11, %v2933_v43  ;;  %v899_v11 = vand.u32 65535, %v2938_v58  ;;  %v2940_v43 = vld [vmem:[#allocation5_spill] sm:$0xff]  ;;  %v2946_v58 = vld [vmem:[#allocation19_spill] sm:$0xff] }
 0x1ea   :  { %vm695_vm2 = vcmp.eq.f32.partialorder %v2946_v58, %v2302_v0  ;;  %v2952_v58 = vld [vmem:[#allocation25_spill] sm:$0xff] }
 0x1ec   :  { %991 = vmin.xlane.f32.xlu0 %v2178_v15  ;;  %1005 = vmin.xlane.f32.xlu1 %v1004_v30  ;;  %v2329_v47 = vpop.xlane.xlu2 %366  ;;  %v775_v15 = vcvt.s32.f32 %v773_v42  ;;  %v787_v30 = vand.u32 65535, %v2934_v23  ;;  %v1422_v42 = vpop.eup %1421  ;;  %v901_v23 = vcvt.s32.f32 %v899_v11  ;;  %v2947_v11 = vld [vmem:[#allocation30_spill] sm:$0xff] }
 0x1ed   :  { %v1424_v57 = vpop.eup %1423  ;;  %1437 = vrcp.f32 %v2329_v47 }
 0x1ee   :  { %v780_v37 = vsel %vm779_vm11, %v775_v15, inf  ;;  %v789_v15 = vcvt.s32.f32 %v787_v30  ;;  %v456_v35 = vmul.f32 %v1424_v57, %v2937_v10  ;;  %v1426_v45 = vpop.eup %1425  ;;  %v2942_v30 = vld [vmem:[#allocation14_spill] sm:$0xff] }
 0x1ef   :  { %v2333_v31 = vpop.xlane.xlu1 %707  ;;  %v2335_v13 = vpop.xlane.xlu0 %380 }
 0x1f0   :  { %v1428_v59 = vpop.eup %1427  ;;  %1439 = vrcp.f32 %v2335_v13 }
 0x1f1   :  { %472 = vmax.xlane.f32.xlu2 %v2248_v9  ;;  %v2932_v9 = vld [vmem:[#allocation24_spill] sm:$0xff]  ;;  %v1430_v57 = vpop.eup %1429 }
 0x1f2   :  { %vm807_vm14 = vcmp.eq.f32.partialorder %v2932_v9, %v2319_v33  ;;  %v2939_v9 = vld [vmem:[#allocation38_spill] sm:$0xff] }
 0x1f3   :  { %v808_v39 = vsel %vm807_vm14, %v803_v12, inf }
 0x1f4   :  { %781 = vmin.xlane.f32.xlu0 %v780_v37  ;;  %683 = vmin.xlane.f32.xlu1 %v682_v49  ;;  %v2344_v7 = vpop.xlane.xlu2 %917  ;;  %v794_v37 = vsel %vm793_vm15, %v789_v15, inf  ;;  %v2936_v49 = vld [vmem:[#allocation6_spill] sm:$0xff]  ;;  %v2943_v15 = vld [vmem:[#allocation15_spill] sm:$0xff] }
 0x1f5   :  { %v440_v41 = vmul.f32 %v1422_v42, %v2936_v49  ;;  %v441_v42 = vmul.f32 %v1428_v59, %v2942_v30  ;;  %v689_v44 = vand.u32 65535, %v2943_v15  ;;  %vm919_vm3 = vcmp.eq.f32.partialorder %v2947_v11, %v2344_v7  ;;  %v2949_v30 = vld [vmem:[#allocation21_spill] sm:$0xff] }
 0x1f6   :  { %vm1017_vm4 = vcmp.eq.f32.partialorder %v2949_v30, %v2309_v55  ;;  %v703_v11 = vand.u32 65535, %v2952_v58  ;;  %v2954_v30 = vld [vmem:[#allocation16_spill] sm:$0xff] }
 0x1f7   :  { %v2349_v51 = vpop.xlane.xlu1 %382  ;;  %v2351_v6 = vpop.xlane.xlu0 %350 }
 0x1f8   :  { %1441 = vrcp.f32 %v2351_v6 }
 0x1f9   :  { %893 = vmin.xlane.f32.xlu2 %v892_v60  ;;  %1443 = vrcp.f32 %v2349_v51 }
 0x1fc   :  { %504 = vmax.xlane.f32.xlu0 %v455_v19  ;;  %809 = vmin.xlane.f32.xlu1 %v808_v39  ;;  %v2359_v36 = vpop.xlane.xlu2 %819  ;;  %v463_v19 = vmul.f32 %v1426_v45, %v2940_v43  ;;  %v2941_v39 = vld [vmem:[#allocation20_spill] sm:$0xff] }
 0x1fd   :  { %vm905_vm1 = vcmp.eq.f32.partialorder %v2941_v39, %v2307_v56 }
 0x1fe   :  { %v906_v46 = vsel %vm905_vm1, %v901_v23, inf  ;;  %v1432_v23 = vpop.eup %1431 }
 0x1ff   :  { %v2364_v48 = vpop.xlane.xlu1 %352  ;;  %v2366_v29 = vpop.xlane.xlu0 %398 }
 0x201   :  { %795 = vmin.xlane.f32.xlu2 %v794_v37  ;;  %v2944_v37 = vld [vmem:[#allocation27_spill] sm:$0xff] }
 0x202   :  { %v913_v49 = vand.u32 65535, %v2944_v37 }
 0x204   :  { %474 = vmax.xlane.f32.xlu0 %v440_v41  ;;  %506 = vmax.xlane.f32.xlu1 %v456_v35  ;;  %v2372_v50 = vpop.xlane.xlu2 %1043  ;;  %v2945_v35 = vld [vmem:[#allocation9_spill] sm:$0xff] }
 0x205   :  { %vm1045_vm0 = vcmp.eq.f32.partialorder %v2939_v9, %v2372_v50  ;;  %v448_v45 = vmul.f32 %v1430_v57, %v2945_v35  ;;  %v915_v9 = vcvt.s32.f32 %v913_v49  ;;  %v2951_v49 = vld [vmem:[#allocation23_spill] sm:$0xff] }
 0x206   :  { %v2382_v12 = vsel %vm1045_vm0, %v1041_v5, inf  ;;  %v691_v5 = vcvt.s32.f32 %v689_v44  ;;  %v2950_v44 = vld [vmem:[#allocation13_spill] sm:$0xff] }
 0x207   :  { %v2378_v61 = vpop.xlane.xlu1 %833  ;;  %v2380_v60 = vpop.xlane.xlu0 %368  ;;  %v920_v43 = vsel %vm919_vm3, %v915_v9, inf  ;;  %v464_v37 = vmul.f32 %v1432_v23, %v2950_v44  ;;  %v1067_v44 = vand.u32 65535, %v2186_v52  ;;  %v2958_v52 = vld [vmem:[#allocation48_spill] sm:$0xff] }
 0x208   :  { %v696_v59 = vsel %vm695_vm2, %v691_v5, inf }
 0x209   :  { %520 = vmax.xlane.f32.xlu2 %v463_v19  ;;  %v2948_v19 = vld [vmem:[#allocation17_spill] sm:$0xff]  ;;  %v1069_v58 = vcvt.s32.f32 %v1067_v44 }
 0x20a   :  { %v1011_v39 = vand.u32 65535, %v2948_v19  ;;  %v705_v19 = vcvt.s32.f32 %v703_v11  ;;  %v2957_v11 = vld [vmem:[#allocation29_spill] sm:$0xff] }
 0x20c   :  { %907 = vmin.xlane.f32.xlu0 %v906_v46  ;;  %476 = vmax.xlane.f32.xlu1 %v441_v42  ;;  %v2388_v26 = vpop.xlane.xlu2 %384  ;;  %v1434_v42 = vpop.eup %1433  ;;  %v1013_v3 = vcvt.s32.f32 %v1011_v39 }
 0x20d   :  { %v465_v35 = vmul.f32 %v1434_v42, %v2951_v49  ;;  %v1436_v9 = vpop.eup %1435  ;;  %v2956_v49 = vld [vmem:[#allocation45_spill] sm:$0xff]  ;;  %1445 = vrcp.f32 %v2388_v26 }
 0x20e   :  { %v1018_v15 = vsel %vm1017_vm4, %v1013_v3, inf  ;;  %v1438_v25 = vpop.eup %1437  ;;  %v449_v42 = vmul.f32 %v1436_v9, %v2954_v30  ;;  %v2955_v3 = vld [vmem:[#allocation26_spill] sm:$0xff]  ;;  %1447 = vrcp.f32 %v2364_v48 }
 0x20f   :  { %v2392_v41 = vpop.xlane.xlu1 %400  ;;  %v2394_v10 = vpop.xlane.xlu0 %931 }
 0x210   :  { %v1440_v13 = vpop.eup %1439 }
 0x211   :  { %490 = vmax.xlane.f32.xlu2 %v448_v45  ;;  %v1053_v45 = vand.u32 65535, %v2151_v21  ;;  %v457_v9 = vmul.f32 %v1440_v13, %v2957_v11  ;;  %v1442_v6 = vpop.eup %1441  ;;  %v2961_v13 = vld [vmem:[#allocation34_spill] sm:$0xff] }
 0x212   :  { %vm821_vm9 = vcmp.eq.f32.partialorder %v2961_v13, %v2359_v36 }
 0x213   :  { %v1055_v39 = vcvt.s32.f32 %v1053_v45 }
 0x214   :  { %697 = vmin.xlane.f32.xlu0 %v696_v59  ;;  %921 = vmin.xlane.f32.xlu1 %v920_v43  ;;  %v2404_v8 = vpop.xlane.xlu2 %354  ;;  %v2953_v59 = vld [vmem:[#allocation28_spill] sm:$0xff] }
 0x215   :  { %vm709_vm5 = vcmp.eq.f32.partialorder %v2953_v59, %v2333_v31  ;;  %1449 = vrcp.f32 %v2404_v8 }
 0x216   :  { %v710_v21 = vsel %vm709_vm5, %v705_v19, inf  ;;  %1451 = vrcp.f32 %v2366_v29 }
 0x217   :  { %v2408_v46 = vpop.xlane.xlu1 %370  ;;  %v2410_v57 = vpop.xlane.xlu0 %721  ;;  %1453 = vrcp.f32 %v2380_v60 }
 0x218   :  { %vm723_vm8 = vcmp.eq.f32.partialorder %v2958_v52, %v2410_v57  ;;  %v1444_v52 = vpop.eup %1443 }
 0x219   :  { %1019 = vmin.xlane.f32.xlu2 %v1018_v15  ;;  %v450_v15 = vmul.f32 %v1438_v25, %v2955_v3 }
 0x21c   :  { %522 = vmax.xlane.f32.xlu0 %v464_v37  ;;  %524 = vmax.xlane.f32.xlu1 %v465_v35  ;;  %v2418_v5 = vpop.xlane.xlu2 %735  ;;  %v717_v35 = vand.u32 65535, %v2956_v49 }
 0x21e   :  { %v719_v59 = vcvt.s32.f32 %v717_v35 }
 0x21f   :  { %v2423_v47 = vpop.xlane.xlu1 %945  ;;  %v2425_v43 = vpop.xlane.xlu0 %1057 }
 0x220   :  { %vm1059_vm6 = vcmp.eq.f32.partialorder %v2176_v24, %v2425_v43  ;;  %v724_v19 = vsel %vm723_vm8, %v719_v59, inf  ;;  %v2963_v59 = vld [vmem:[#allocation43_spill] sm:$0xff] }
 0x221   :  { %v2429_v23 = vsel %vm1059_vm6, %v1055_v39, inf  ;;  %711 = vmin.xlane.f32.xlu2 %v710_v21  ;;  %v2959_v21 = vld [vmem:[#allocation31_spill] sm:$0xff]  ;;  %vm933_vm11 = vcmp.eq.f32.partialorder %v2963_v59, %v2394_v10 }
 0x222   :  { %v815_v30 = vand.u32 65535, %v2959_v21 }
 0x224   :  { %492 = vmax.xlane.f32.xlu0 %v449_v42  ;;  %494 = vmax.xlane.f32.xlu1 %v450_v15  ;;  %v2434_v37 = vpop.xlane.xlu2 %402  ;;  %v2960_v15 = vld [vmem:[#allocation32_spill] sm:$0xff] }
 0x225   :  { %v442_v44 = vmul.f32 %v1442_v6, %v2960_v15  ;;  %1455 = vrcp.f32 %v2434_v37 }
 0x227   :  { %v2438_v24 = vpop.xlane.xlu1 %1071  ;;  %v2440_v45 = vpop.xlane.xlu0 %847 }
 0x228   :  { %vm1073_vm7 = vcmp.eq.f32.partialorder %v2205_v27, %v2438_v24  ;;  %v843_v27 = vand.u32 65535, %v2183_v4  ;;  %vm849_vm10 = vcmp.eq.f32.partialorder %v2207_v38, %v2440_v45  ;;  %v1446_v38 = vpop.eup %1445 }
 0x229   :  { %v2447_v25 = vsel %vm1073_vm7, %v1069_v58, inf  ;;  %508 = vmax.xlane.f32.xlu2 %v457_v9  ;;  %v2962_v58 = vld [vmem:[#allocation41_spill] sm:$0xff]  ;;  %v644_v9 = vcvt.f32.s32 %v2101_v2  ;;  %v1448_v8 = vpop.eup %1447 }
 0x22a   :  { %v845_v49 = vcvt.s32.f32 %v843_v27  ;;  %v927_v11 = vand.u32 65535, %v2962_v58  ;;  %v756_v27 = vcvt.f32.s32 %v2082_v20  ;;  %v770_v58 = vcvt.f32.s32 %v2163_v40 }
 0x22b   :  { %v645_v21 = vshll.u32 %v644_v9, 16  ;;  %v2967_v9 = vld [vmem:[#allocation39_spill] sm:$0xff] }
 0x22c   :  { %1033 = vmin.xlane.f32.xlu0 %v2326_v1  ;;  %725 = vmin.xlane.f32.xlu1 %v724_v19  ;;  %v2450_v39 = vpop.xlane.xlu2 %372  ;;  %v817_v1 = vcvt.s32.f32 %v815_v30  ;;  %v850_v35 = vsel %vm849_vm10, %v845_v49, inf  ;;  %v929_v6 = vcvt.s32.f32 %v927_v11  ;;  %v757_v20 = vshll.u32 %v756_v27, 16  ;;  %v2968_v27 = vld [vmem:[#allocation35_spill] sm:$0xff] }
 0x22d   :  { %vm835_vm13 = vcmp.eq.f32.partialorder %v2967_v9, %v2378_v61 }
 0x22e   :  { %v822_v4 = vsel %vm821_vm9, %v817_v1, inf  ;;  %v934_v2 = vsel %vm933_vm11, %v929_v6, inf  ;;  %v2965_v1 = vld [vmem:[#allocation42_spill] sm:$0xff] }
 0x22f   :  { %v2454_v42 = vpop.xlane.xlu1 %388  ;;  %v2456_v3 = vpop.xlane.xlu0 %386  ;;  %v459_v49 = vmul.f32 %v1446_v38, %v2965_v1  ;;  %v868_v1 = vcvt.f32.s32 %v2122_v22 }
 0x230   :  { %1457 = vrcp.f32 %v2456_v3  ;;  %v672_v3 = vcvt.f32.s32 %v2198_v34 }
 0x231   :  { %478 = vmax.xlane.f32.xlu2 %v442_v44  ;;  %v2964_v44 = vld [vmem:[#allocation33_spill] sm:$0xff]  ;;  %1459 = vrcp.f32 %v2392_v41 }
 0x232   :  { %v458_v13 = vmul.f32 %v1444_v52, %v2964_v44  ;;  %v1450_v52 = vpop.eup %1449  ;;  %v2969_v44 = vld [vmem:[#allocation46_spill] sm:$0xff]  ;;  %1461 = vrcp.f32 %v2450_v39 }
 0x234   :  { %823 = vmin.xlane.f32.xlu0 %v822_v4  ;;  %851 = vmin.xlane.f32.xlu1 %v850_v35  ;;  %v2467_v51 = vpop.xlane.xlu2 %959  ;;  %v2966_v4 = vld [vmem:[#allocation37_spill] sm:$0xff] }
 0x235   :  { %v829_v35 = vand.u32 65535, %v2966_v4 }
 0x237   :  { %v642_v19 = vpop.xlane.xlu1 %641  ;;  %v2471_v26 = vpop.xlane.xlu0 %356  ;;  %v831_v40 = vcvt.s32.f32 %v829_v35 }
 0x238   :  { %v643_v30 = vcvt.f32.s32 %v642_v19  ;;  %v771_v19 = vshll.u32 %v770_v58, 16  ;;  %v2971_v58 = vld [vmem:[#allocation50_spill] sm:$0xff]  ;;  %1463 = vrcp.f32 %v2471_v26  ;;  %v2980_v26 = vld [vmem:[#allocation44_spill] sm:$0xff] }
 0x239   :  { %935 = vmin.xlane.f32.xlu2 %v934_v2  ;;  %v980_v2 = vcvt.f32.s32 %v2127_v16  ;;  %v2970_v16 = vld [vmem:[#allocation56_spill] sm:$0xff]  ;;  %1465 = vrcp.f32 %v2408_v46 }
 0x23a   :  { %v646_v15 = vadd.s32 %v645_v21, %v643_v30  ;;  %v836_v30 = vsel %vm835_vm13, %v831_v40, inf  ;;  %v955_v4 = vand.u32 65535, %v2970_v16  ;;  %v2973_v40 = vld [vmem:[#allocation59_spill] sm:$0xff] }
 0x23b   :  { %vm961_vm14 = vcmp.eq.f32.partialorder %v2973_v40, %v2467_v51 }
 0x23c   :  { %1081 = vst.msk [vmem:[%s2807_s4] sm:$0xff] %vm534_vm12, %v646_v15  ;;  %510 = vmax.xlane.f32.xlu0 %v458_v13  ;;  %512 = vmax.xlane.f32.xlu1 %v459_v49  ;;  %v754_v48 = vpop.xlane.xlu2 %753  ;;  %v443_v15 = vmul.f32 %v1448_v8, %v2968_v27  ;;  %v444_v13 = vmul.f32 %v1450_v52, %v2969_v44  ;;  %v1452_v49 = vpop.eup %1451  ;;  %v2972_v52 = vld [vmem:[#allocation36_spill] sm:$0xff]  ;;  %v658_v27 = vcvt.f32.s32 %v2157_v32 }
 0x23d   :  { %v755_v11 = vcvt.f32.s32 %v754_v48  ;;  %v941_v48 = vand.u32 65535, %v2971_v58 }
 0x23f   :  { %v768_v59 = vpop.xlane.xlu1 %767  ;;  %v2487_v38 = vpop.xlane.xlu0 %404  ;;  %v758_v6 = vadd.s32 %v757_v20, %v755_v11  ;;  %v981_v20 = vshll.u32 %v980_v2, 16  ;;  %v869_v11 = vshll.u32 %v868_v1, 16  ;;  %v943_v60 = vcvt.s32.f32 %v941_v48  ;;  %v2976_v48 = vld [vmem:[#allocation40_spill] sm:$0xff] }
 0x240   :  { %v769_v21 = vcvt.f32.s32 %v768_v59  ;;  %v466_v59 = vmul.f32 %v1452_v49, %v2972_v52  ;;  %v882_v2 = vcvt.f32.s32 %v2129_v28  ;;  %v2975_v28 = vld [vmem:[#allocation47_spill] sm:$0xff]  ;;  %v2978_v52 = vld [vmem:[#allocation54_spill] sm:$0xff]  ;;  %1467 = vrcp.f32 %v2487_v38 }
 0x241   :  { %1089 = vst.msk [vmem:[%s2807_s4 + $0x40] sm:$0xff] %vm534_vm12, %v758_v6  ;;  %837 = vmin.xlane.f32.xlu2 %v836_v30  ;;  %v957_v30 = vcvt.s32.f32 %v955_v4  ;;  %v731_v37 = vand.u32 65535, %v2975_v28  ;;  %1469 = vrcp.f32 %v2454_v42 }
 0x242   :  { %v772_v29 = vadd.s32 %v771_v19, %v769_v21  ;;  %v2974_v21 = vld [vmem:[#allocation53_spill] sm:$0xff]  ;;  %v883_v49 = vshll.u32 %v882_v2, 16 }
 0x243   :  { %vm947_vm15 = vcmp.eq.f32.partialorder %v2974_v21, %v2423_v47  ;;  %v962_v44 = vsel %vm961_vm14, %v957_v30, inf }
 0x244   :  { %1090 = vst.msk [vmem:[%s2807_s4 + $0x48] sm:$0xff] %vm534_vm12, %v772_v29  ;;  %480 = vmax.xlane.f32.xlu0 %v443_v15  ;;  %482 = vmax.xlane.f32.xlu1 %v444_v13  ;;  %v978_v35 = vpop.xlane.xlu2 %977  ;;  %v948_v15 = vsel %vm947_vm15, %v943_v60, inf  ;;  %v1454_v13 = vpop.eup %1453 }
 0x245   :  { %v979_v8 = vcvt.f32.s32 %v978_v35  ;;  %v1456_v4 = vpop.eup %1455  ;;  %v659_v35 = vshll.u32 %v658_v27, 16  ;;  %v2979_v27 = vld [vmem:[#allocation57_spill] sm:$0xff] }
 0x246   :  { %v1458_v39 = vpop.eup %1457 }
 0x247   :  { %v471_v9 = vpop.xlane.xlu1 %470  ;;  %v866_v22 = vpop.xlane.xlu0 %865  ;;  %v982_v19 = vadd.s32 %v981_v20, %v979_v8  ;;  %v451_v20 = vmul.f32 %v1454_v13, %v2976_v48  ;;  %v2977_v8 = vld [vmem:[#allocation52_spill] sm:$0xff]  ;;  %v2981_v13 = vld [vmem:[#allocation55_spill] sm:$0xff] }
 0x248   :  { %535 = vst.msk [vmem:[%s2808_s3] sm:$0xff] %vm534_vm12, %v471_v9  ;;  %v867_v6 = vcvt.f32.s32 %v866_v22  ;;  %vm737_vm0 = vcmp.eq.f32.partialorder %v2977_v8, %v2418_v5  ;;  %v733_v22 = vcvt.s32.f32 %v731_v37  ;;  %v1460_v34 = vpop.eup %1459  ;;  %v2982_v37 = vld [vmem:[#allocation51_spill] sm:$0xff] }
 0x249   :  { %1105 = vst.msk [vmem:[%s2807_s4 + $0xc0] sm:$0xff] %vm534_vm12, %v982_v19  ;;  %526 = vmax.xlane.f32.xlu2 %v466_v59  ;;  %v468_v59 = vmul.f32 %v1456_v4, %v2978_v52  ;;  %v1462_v60 = vpop.eup %1461  ;;  %v784_v52 = vcvt.f32.s32 %v2235_v17 }
 0x24a   :  { %v870_v29 = vadd.s32 %v869_v11, %v867_v6  ;;  %v738_v40 = vsel %vm737_vm0, %v733_v22, inf  ;;  %v673_v6 = vshll.u32 %v672_v3, 16  ;;  %v453_v28 = vmul.f32 %v1462_v60, %v2981_v13  ;;  %v1464_v46 = vpop.eup %1463  ;;  %v2984_v3 = vld [vmem:[#allocation49_spill] sm:$0xff] }
 0x24b   :  { %v1466_v4 = vpop.eup %1465 }
 0x24c   :  { %1097 = vst.msk [vmem:[%s2807_s4 + $0x80] sm:$0xff] %vm534_vm12, %v870_v29  ;;  %949 = vmin.xlane.f32.xlu0 %v948_v15  ;;  %963 = vmin.xlane.f32.xlu1 %v962_v44  ;;  %v880_v1 = vpop.xlane.xlu2 %879  ;;  %v460_v15 = vmul.f32 %v1458_v39, %v2979_v27  ;;  %v467_v44 = vmul.f32 %v1460_v34, %v2980_v26  ;;  %v1468_v38 = vpop.eup %1467  ;;  %v812_v27 = vcvt.f32.s32 %v2319_v33  ;;  %v798_v33 = vcvt.f32.s32 %v2261_v53 }
 0x24d   :  { %v881_v16 = vcvt.f32.s32 %v880_v1  ;;  %v994_v1 = vcvt.f32.s32 %v2982_v37  ;;  %v1470_v17 = vpop.eup %1469 }
 0x24e   :  { %v813_v13 = vshll.u32 %v812_v27, 16 }
 0x24f   :  { %v519_v32 = vpop.xlane.xlu1 %518  ;;  %v656_v58 = vpop.xlane.xlu0 %655  ;;  %v884_v11 = vadd.s32 %v883_v49, %v881_v16  ;;  %v1008_v49 = vcvt.f32.s32 %v2256_v14 }
 0x250   :  { %559 = vst.msk [vmem:[%s2808_s3 + $0xc0] sm:$0xff] %vm534_vm12, %v519_v32  ;;  %v657_v9 = vcvt.f32.s32 %v656_v58 }
 0x251   :  { %1098 = vst.msk [vmem:[%s2807_s4 + $0x88] sm:$0xff] %vm534_vm12, %v884_v11  ;;  %496 = vmax.xlane.f32.xlu2 %v451_v20  ;;  %v1009_v48 = vshll.u32 %v1008_v49, 16  ;;  %v2983_v11 = vld [vmem:[#allocation60_spill] sm:$0xff] }
 0x252   :  { %v660_v41 = vadd.s32 %v659_v35, %v657_v9  ;;  %v995_v35 = vshll.u32 %v994_v1, 16  ;;  %v445_v14 = vmul.f32 %v1464_v46, %v2983_v11  ;;  %v799_v46 = vshll.u32 %v798_v33, 16 }
 0x253   :  { %v700_v11 = vcvt.f32.s32 %v2302_v0  ;;  %v1022_v0 = vcvt.f32.s32 %v2309_v55  ;;  %v714_v55 = vcvt.f32.s32 %v2333_v31  ;;  %v1036_v31 = vcvt.f32.s32 %v2317_v18 }
 0x254   :  { %1082 = vst.msk [vmem:[%s2807_s4 + $0x8] sm:$0xff] %vm534_vm12, %v660_v41  ;;  %739 = vmin.xlane.f32.xlu0 %v738_v40  ;;  %530 = vmax.xlane.f32.xlu1 %v468_v59  ;;  %v670_v19 = vpop.xlane.xlu2 %669  ;;  %v452_v41 = vmul.f32 %v1466_v4, %v2984_v3  ;;  %v686_v59 = vcvt.f32.s32 %v2294_v54  ;;  %v785_v54 = vshll.u32 %v784_v52, 16  ;;  %v854_v18 = vcvt.f32.s32 %v2440_v45 }
 0x255   :  { %v671_v21 = vcvt.f32.s32 %v670_v19  ;;  %v701_v3 = vshll.u32 %v700_v11, 16 }
 0x256   :  { %v687_v19 = vshll.u32 %v686_v59, 16  ;;  %v855_v45 = vshll.u32 %v854_v18, 16 }
 0x257   :  { %v489_v30 = vpop.xlane.xlu1 %488  ;;  %v487_v2 = vpop.xlane.xlu0 %486  ;;  %v674_v29 = vadd.s32 %v673_v6, %v671_v21  ;;  %v896_v21 = vcvt.f32.s32 %v2278_v63 }
 0x258   :  { %544 = vst.msk [vmem:[%s2808_s3 + $0x48] sm:$0xff] %vm534_vm12, %v489_v30 }
 0x259   :  { %543 = vst.msk [vmem:[%s2808_s3 + $0x40] sm:$0xff] %vm534_vm12, %v487_v2  ;;  %514 = vmax.xlane.f32.xlu2 %v460_v15  ;;  %v2985_v2 = vld [vmem:[#allocation58_spill] sm:$0xff]  ;;  %v897_v63 = vshll.u32 %v896_v21, 16 }
 0x25a   :  { %1083 = vst.msk [vmem:[%s2807_s4 + $0x10] sm:$0xff] %vm534_vm12, %v674_v29  ;;  %v461_v29 = vmul.f32 %v1470_v17, %v2985_v2  ;;  %v1023_v17 = vshll.u32 %v1022_v0, 16  ;;  %v728_v2 = vcvt.f32.s32 %v2410_v57 }
 0x25c   :  { %528 = vmax.xlane.f32.xlu0 %v467_v44  ;;  %500 = vmax.xlane.f32.xlu1 %v453_v28  ;;  %v503_v16 = vpop.xlane.xlu2 %502 }
 0x25d   :  { %551 = vst.msk [vmem:[%s2808_s3 + $0x80] sm:$0xff] %vm534_vm12, %v503_v16 }
 0x25f   :  { %v1006_v32 = vpop.xlane.xlu1 %1005  ;;  %v992_v58 = vpop.xlane.xlu0 %991 }
 0x260   :  { %v1007_v20 = vcvt.f32.s32 %v1006_v32  ;;  %v993_v8 = vcvt.f32.s32 %v992_v58 }
 0x261   :  { %484 = vmax.xlane.f32.xlu2 %v445_v14 }
 0x262   :  { %v1010_v9 = vadd.s32 %v1009_v48, %v1007_v20  ;;  %v996_v22 = vadd.s32 %v995_v35, %v993_v8 }
 0x264   :  { %1107 = vst.msk [vmem:[%s2807_s4 + $0xd0] sm:$0xff] %vm534_vm12, %v1010_v9  ;;  %498 = vmax.xlane.f32.xlu0 %v452_v41  ;;  %1047 = vmin.xlane.f32.xlu1 %v2382_v12  ;;  %v473_v42 = vpop.xlane.xlu2 %472  ;;  %v469_v12 = vmul.f32 %v1468_v38, %v2267_v62 }
 0x265   :  { %1106 = vst.msk [vmem:[%s2807_s4 + $0xc8] sm:$0xff] %vm534_vm12, %v996_v22 }
 0x266   :  { %536 = vst.msk [vmem:[%s2808_s3 + $0x8] sm:$0xff] %vm534_vm12, %v473_v42 }
 0x267   :  { %v684_v40 = vpop.xlane.xlu1 %683  ;;  %v782_v39 = vpop.xlane.xlu0 %781 }
 0x268   :  { %v685_v34 = vcvt.f32.s32 %v684_v40  ;;  %v783_v6 = vcvt.f32.s32 %v782_v39 }
 0x269   :  { %532 = vmax.xlane.f32.xlu2 %v469_v12 }
 0x26a   :  { %v688_v60 = vadd.s32 %v687_v19, %v685_v34  ;;  %v786_v30 = vadd.s32 %v785_v54, %v783_v6  ;;  %v715_v6 = vshll.u32 %v714_v55, 16 }
 0x26c   :  { %1084 = vst.msk [vmem:[%s2807_s4 + $0x18] sm:$0xff] %vm534_vm12, %v688_v60  ;;  %516 = vmax.xlane.f32.xlu0 %v461_v29  ;;  %v894_v62 = vpop.xlane.xlu2 %893 }
 0x26d   :  { %1091 = vst.msk [vmem:[%s2807_s4 + $0x50] sm:$0xff] %vm534_vm12, %v786_v30  ;;  %v895_v15 = vcvt.f32.s32 %v894_v62 }
 0x26f   :  { %v810_v26 = vpop.xlane.xlu1 %809  ;;  %v505_v44 = vpop.xlane.xlu0 %504  ;;  %v898_v28 = vadd.s32 %v897_v63, %v895_v15  ;;  %v1037_v63 = vshll.u32 %v1036_v31, 16  ;;  %v729_v15 = vshll.u32 %v728_v2, 16 }
 0x270   :  { %v811_v37 = vcvt.f32.s32 %v810_v26  ;;  %552 = vst.msk [vmem:[%s2808_s3 + $0x88] sm:$0xff] %vm534_vm12, %v505_v44 }
 0x271   :  { %1099 = vst.msk [vmem:[%s2807_s4 + $0x90] sm:$0xff] %vm534_vm12, %v898_v28  ;;  %1061 = vmin.xlane.f32.xlu2 %v2429_v23  ;;  %v910_v23 = vcvt.f32.s32 %v2307_v56  ;;  %v924_v56 = vcvt.f32.s32 %v2344_v7 }
 0x272   :  { %v814_v1 = vadd.s32 %v813_v13, %v811_v37  ;;  %v826_v37 = vcvt.f32.s32 %v2359_v36 }
 0x273   :  { %v911_v48 = vshll.u32 %v910_v23, 16  ;;  %v925_v41 = vshll.u32 %v924_v56, 16 }
 0x274   :  { %1093 = vst.msk [vmem:[%s2807_s4 + $0x60] sm:$0xff] %vm534_vm12, %v814_v1  ;;  %1075 = vmin.xlane.f32.xlu0 %v2447_v25  ;;  %v796_v49 = vpop.xlane.xlu2 %795  ;;  %v827_v1 = vshll.u32 %v826_v37, 16 }
 0x275   :  { %v797_v16 = vcvt.f32.s32 %v796_v49 }
 0x277   :  { %v507_v4 = vpop.xlane.xlu1 %506  ;;  %v475_v53 = vpop.xlane.xlu0 %474  ;;  %v800_v35 = vadd.s32 %v799_v46, %v797_v16  ;;  %v938_v16 = vcvt.f32.s32 %v2394_v10  ;;  %v840_v10 = vcvt.f32.s32 %v2378_v61  ;;  %v952_v61 = vcvt.f32.s32 %v2423_v47 }
 0x278   :  { %553 = vst.msk [vmem:[%s2808_s3 + $0x90] sm:$0xff] %vm534_vm12, %v507_v4 }
 0x279   :  { %537 = vst.msk [vmem:[%s2808_s3 + $0x10] sm:$0xff] %vm534_vm12, %v475_v53  ;;  %v939_v23 = vshll.u32 %v938_v16, 16 }
 0x27a   :  { %1092 = vst.msk [vmem:[%s2807_s4 + $0x58] sm:$0xff] %vm534_vm12, %v800_v35 }
 0x27c   :  { %v521_v25 = vpop.xlane.xlu2 %520 }
 0x27d   :  { %560 = vst.msk [vmem:[%s2808_s3 + $0xc8] sm:$0xff] %vm534_vm12, %v521_v25 }
 0x27f   :  { %v477_v32 = vpop.xlane.xlu1 %476  ;;  %v908_v58 = vpop.xlane.xlu0 %907 }
 0x280   :  { %538 = vst.msk [vmem:[%s2808_s3 + $0x18] sm:$0xff] %vm534_vm12, %v477_v32  ;;  %v909_v20 = vcvt.f32.s32 %v908_v58 }
 0x282   :  { %v912_v8 = vadd.s32 %v911_v48, %v909_v20 }
 0x284   :  { %1100 = vst.msk [vmem:[%s2807_s4 + $0x98] sm:$0xff] %vm534_vm12, %v912_v8  ;;  %v491_v14 = vpop.xlane.xlu2 %490  ;;  %v841_v8 = vshll.u32 %v840_v10, 16 }
 0x285   :  { %545 = vst.msk [vmem:[%s2808_s3 + $0x50] sm:$0xff] %vm534_vm12, %v491_v14 }
 0x287   :  { %v922_v9 = vpop.xlane.xlu1 %921  ;;  %v698_v22 = vpop.xlane.xlu0 %697 }
 0x288   :  { %v923_v52 = vcvt.f32.s32 %v922_v9  ;;  %v699_v59 = vcvt.f32.s32 %v698_v22  ;;  %v966_v22 = vcvt.f32.s32 %v2467_v51 }
 0x28a   :  { %v926_v7 = vadd.s32 %v925_v41, %v923_v52  ;;  %v702_v38 = vadd.s32 %v701_v3, %v699_v59  ;;  %v953_v59 = vshll.u32 %v952_v61, 16  ;;  %v967_v0 = vshll.u32 %v966_v22, 16 }
 0x28c   :  { %1101 = vst.msk [vmem:[%s2807_s4 + $0xa0] sm:$0xff] %vm534_vm12, %v926_v7  ;;  %v1020_v42 = vpop.xlane.xlu2 %1019 }
 0x28d   :  { %1085 = vst.msk [vmem:[%s2807_s4 + $0x20] sm:$0xff] %vm534_vm12, %v702_v38  ;;  %v1021_v54 = vcvt.f32.s32 %v1020_v42 }
 0x28f   :  { %v525_v40 = vpop.xlane.xlu1 %524  ;;  %v523_v39 = vpop.xlane.xlu0 %522  ;;  %v1024_v19 = vadd.s32 %v1023_v17, %v1021_v54  ;;  %v742_v54 = vcvt.f32.s32 %v2418_v5 }
 0x290   :  { %562 = vst.msk [vmem:[%s2808_s3 + $0xd8] sm:$0xff] %vm534_vm12, %v525_v40 }
 0x291   :  { %561 = vst.msk [vmem:[%s2808_s3 + $0xd0] sm:$0xff] %vm534_vm12, %v523_v39  ;;  %v743_v39 = vshll.u32 %v742_v54, 16 }
 0x292   :  { %1108 = vst.msk [vmem:[%s2807_s4 + $0xd8] sm:$0xff] %vm534_vm12, %v1024_v19 }
 0x294   :  { %v712_v34 = vpop.xlane.xlu2 %711 }
 0x295   :  { %v713_v12 = vcvt.f32.s32 %v712_v34 }
 0x297   :  { %v495_v21 = vpop.xlane.xlu1 %494  ;;  %v493_v60 = vpop.xlane.xlu0 %492  ;;  %v716_v30 = vadd.s32 %v715_v6, %v713_v12  ;;  %v1050_v12 = vcvt.f32.s32 %v2372_v50 }
 0x298   :  { %547 = vst.msk [vmem:[%s2808_s3 + $0x60] sm:$0xff] %vm534_vm12, %v495_v21 }
 0x299   :  { %546 = vst.msk [vmem:[%s2808_s3 + $0x58] sm:$0xff] %vm534_vm12, %v493_v60  ;;  %v1051_v31 = vshll.u32 %v1050_v12, 16 }
 0x29a   :  { %1086 = vst.msk [vmem:[%s2807_s4 + $0x28] sm:$0xff] %vm534_vm12, %v716_v30 }
 0x29c   :  { %v509_v29 = vpop.xlane.xlu2 %508 }
 0x29d   :  { %554 = vst.msk [vmem:[%s2808_s3 + $0x98] sm:$0xff] %vm534_vm12, %v509_v29 }
 0x29f   :  { %v726_v27 = vpop.xlane.xlu1 %725  ;;  %v1034_v62 = vpop.xlane.xlu0 %1033 }
 0x2a0   :  { %v727_v26 = vcvt.f32.s32 %v726_v27  ;;  %v1035_v44 = vcvt.f32.s32 %v1034_v62  ;;  %v1064_v62 = vcvt.f32.s32 %v2425_v43 }
 0x2a2   :  { %v730_v13 = vadd.s32 %v729_v15, %v727_v26  ;;  %v1038_v28 = vadd.s32 %v1037_v63, %v1035_v44  ;;  %v1078_v63 = vcvt.f32.s32 %v2438_v24  ;;  %v1065_v26 = vshll.u32 %v1064_v62, 16 }
 0x2a4   :  { %1087 = vst.msk [vmem:[%s2807_s4 + $0x30] sm:$0xff] %vm534_vm12, %v730_v13  ;;  %v479_v57 = vpop.xlane.xlu2 %478 }
 0x2a5   :  { %1109 = vst.msk [vmem:[%s2807_s4 + $0xe0] sm:$0xff] %vm534_vm12, %v1038_v28  ;;  %v1079_v28 = vshll.u32 %v1078_v63, 16 }
 0x2a6   :  { %539 = vst.msk [vmem:[%s2808_s3 + $0x20] sm:$0xff] %vm534_vm12, %v479_v57 }
 0x2a7   :  { %v852_v33 = vpop.xlane.xlu1 %851  ;;  %v824_v36 = vpop.xlane.xlu0 %823 }
 0x2a8   :  { %v853_v49 = vcvt.f32.s32 %v852_v33  ;;  %v825_v46 = vcvt.f32.s32 %v824_v36 }
 0x2aa   :  { %v856_v4 = vadd.s32 %v855_v45, %v853_v49  ;;  %v828_v53 = vadd.s32 %v827_v1, %v825_v46 }
 0x2ac   :  { %1096 = vst.msk [vmem:[%s2807_s4 + $0x78] sm:$0xff] %vm534_vm12, %v856_v4  ;;  %v936_v35 = vpop.xlane.xlu2 %935 }
 0x2ad   :  { %1094 = vst.msk [vmem:[%s2807_s4 + $0x68] sm:$0xff] %vm534_vm12, %v828_v53  ;;  %v937_v25 = vcvt.f32.s32 %v936_v35 }
 0x2af   :  { %v513_v32 = vpop.xlane.xlu1 %512  ;;  %v511_v58 = vpop.xlane.xlu0 %510  ;;  %v940_v48 = vadd.s32 %v939_v23, %v937_v25 }
 0x2b0   :  { %556 = vst.msk [vmem:[%s2808_s3 + $0xa8] sm:$0xff] %vm534_vm12, %v513_v32 }
 0x2b1   :  { %555 = vst.msk [vmem:[%s2808_s3 + $0xa0] sm:$0xff] %vm534_vm12, %v511_v58 }
 0x2b2   :  { %1102 = vst.msk [vmem:[%s2807_s4 + $0xa8] sm:$0xff] %vm534_vm12, %v940_v48 }
 0x2b4   :  { %v838_v20 = vpop.xlane.xlu2 %837 }
 0x2b5   :  { %v839_v11 = vcvt.f32.s32 %v838_v20 }
 0x2b7   :  { %v483_v56 = vpop.xlane.xlu1 %482  ;;  %v481_v14 = vpop.xlane.xlu0 %480  ;;  %v842_v9 = vadd.s32 %v841_v8, %v839_v11 }
 0x2b8   :  { %541 = vst.msk [vmem:[%s2808_s3 + $0x30] sm:$0xff] %vm534_vm12, %v483_v56 }
 0x2b9   :  { %540 = vst.msk [vmem:[%s2808_s3 + $0x28] sm:$0xff] %vm534_vm12, %v481_v14 }
 0x2ba   :  { %1095 = vst.msk [vmem:[%s2807_s4 + $0x70] sm:$0xff] %vm534_vm12, %v842_v9 }
 0x2bc   :  { %v527_v3 = vpop.xlane.xlu2 %526 }
 0x2bd   :  { %563 = vst.msk [vmem:[%s2808_s3 + $0xe0] sm:$0xff] %vm534_vm12, %v527_v3 }
 0x2bf   :  { %v964_v41 = vpop.xlane.xlu1 %963  ;;  %v950_v52 = vpop.xlane.xlu0 %949 }
 0x2c0   :  { %v965_v7 = vcvt.f32.s32 %v964_v41  ;;  %v951_v38 = vcvt.f32.s32 %v950_v52 }
 0x2c2   :  { %v968_v42 = vadd.s32 %v967_v0, %v965_v7  ;;  %v954_v17 = vadd.s32 %v953_v59, %v951_v38 }
 0x2c4   :  { %1104 = vst.msk [vmem:[%s2807_s4 + $0xb8] sm:$0xff] %vm534_vm12, %v968_v42  ;;  %v497_v47 = vpop.xlane.xlu2 %496 }
 0x2c5   :  { %1103 = vst.msk [vmem:[%s2807_s4 + $0xb0] sm:$0xff] %vm534_vm12, %v954_v17 }
 0x2c6   :  { %548 = vst.msk [vmem:[%s2808_s3 + $0x68] sm:$0xff] %vm534_vm12, %v497_v47 }
 0x2c7   :  { %v531_v51 = vpop.xlane.xlu1 %530  ;;  %v740_v40 = vpop.xlane.xlu0 %739 }
 0x2c8   :  { %565 = vst.msk [vmem:[%s2808_s3 + $0xf0] sm:$0xff] %vm534_vm12, %v531_v51  ;;  %v741_v5 = vcvt.f32.s32 %v740_v40 }
 0x2ca   :  { %v744_v19 = vadd.s32 %v743_v39, %v741_v5 }
 0x2cc   :  { %1088 = vst.msk [vmem:[%s2807_s4 + $0x38] sm:$0xff] %vm534_vm12, %v744_v19  ;;  %v515_v55 = vpop.xlane.xlu2 %514 }
 0x2cd   :  { %557 = vst.msk [vmem:[%s2808_s3 + $0xb0] sm:$0xff] %vm534_vm12, %v515_v55 }
 0x2cf   :  { %v501_v34 = vpop.xlane.xlu1 %500  ;;  %v529_v6 = vpop.xlane.xlu0 %528 }
 0x2d0   :  { %550 = vst.msk [vmem:[%s2808_s3 + $0x78] sm:$0xff] %vm534_vm12, %v501_v34 }
 0x2d1   :  { %564 = vst.msk [vmem:[%s2808_s3 + $0xe8] sm:$0xff] %vm534_vm12, %v529_v6 }
 0x2d4   :  { %v485_v21 = vpop.xlane.xlu2 %484 }
 0x2d5   :  { %542 = vst.msk [vmem:[%s2808_s3 + $0x38] sm:$0xff] %vm534_vm12, %v485_v21 }
 0x2d7   :  { %v1048_v60 = vpop.xlane.xlu1 %1047  ;;  %v499_v30 = vpop.xlane.xlu0 %498 }
 0x2d8   :  { %v1049_v2 = vcvt.f32.s32 %v1048_v60  ;;  %549 = vst.msk [vmem:[%s2808_s3 + $0x70] sm:$0xff] %vm534_vm12, %v499_v30 }
 0x2da   :  { %v1052_v29 = vadd.s32 %v1051_v31, %v1049_v2 }
 0x2dc   :  { %1110 = vst.msk [vmem:[%s2807_s4 + $0xe8] sm:$0xff] %vm534_vm12, %v1052_v29  ;;  %v533_v50 = vpop.xlane.xlu2 %532 }
 0x2dd   :  { %566 = vst.msk [vmem:[%s2808_s3 + $0xf8] sm:$0xff] %vm534_vm12, %v533_v50 }
 0x2df   :  { %v517_v27 = vpop.xlane.xlu0 %516 }
 0x2e0   :  { %558 = vst.msk [vmem:[%s2808_s3 + $0xb8] sm:$0xff] %vm534_vm12, %v517_v27 }
 0x2e4   :  { %v1062_v15 = vpop.xlane.xlu2 %1061 }
 0x2e5   :  { %v1063_v44 = vcvt.f32.s32 %v1062_v15 }
 0x2e7   :  { %v1076_v13 = vpop.xlane.xlu0 %1075  ;;  %v1066_v37 = vadd.s32 %v1065_v26, %v1063_v44 }
 0x2e8   :  { %v1077_v18 = vcvt.f32.s32 %v1076_v13 }
 0x2e9   :  { %1111 = vst.msk [vmem:[%s2807_s4 + $0xf0] sm:$0xff] %vm534_vm12, %v1066_v37 }
 0x2ea   :  { %v1080_v57 = vadd.s32 %v1079_v28, %v1077_v18 }
 0x2ec   :  { %1112 = vst.msk [vmem:[%s2807_s4 + $0xf8] sm:$0xff] %vm534_vm12, %v1080_v57 }

// kernel: experts_forward.3
= control target key start
LH: loop header
LB: loop body
LE: loop exit
PB: predicated region body
PF: predicated region fallthrough
CT: control target
= control target key end

     0   :  { %s1325_s27 = smov [#allocation4]   ;;  %s1326_s28 = smov [#allocation5]   ;;  %s1708_s0 = inlined_call_operand.vmem [shape: s32[5], index: 0, kind: input, shape index: {}]   ;;  %s1709_s2 = inlined_call_operand.vmem [shape: bf16[1280,128], index: 2, kind: input, shape index: {}]   ;;  %s1710_s3 = inlined_call_operand.vmem [shape: bf16[4,2,128,128], index: 3, kind: input, shape index: {}]   ;;  %s1711_s4 = inlined_call_operand.vmem [shape: f32[4,2,1,128], index: 4, kind: input, shape index: {}]   ;;  %s1712_s5 = inlined_call_operand.vmem [shape: f32[1280,1], index: 5, kind: input, shape index: {}]   ;;  %s1713_s6 = inlined_call_operand.vmem [shape: f32[1280,128], index: 6, kind: output, shape index: {}]   ;;  %s1714_s1 = inlined_call_operand.vmem [shape: s32[5], index: 1, kind: input, shape index: {}]  }
   0x1   :  { %1715 = sst [smem:[#allocation7_spill]] %s1709_s2  ;;  %s12_s23 = sshll.u32 %s1708_s0, 4  ;;  %s13_s23 = int_to_ptr.vmem [resolvable:$true] %s12_s23 }
   0x2   :  { %1716 = sst [smem:[#allocation8_spill]] %s1712_s5  ;;  %s17_s26 = sshll.u32 %s1714_s1, 4  ;;  %s18_s26 = int_to_ptr.vmem [resolvable:$true] %s17_s26 }
   0x3   :  { %15 = dma.vmem_to_smem %s13_s23, 16, %s1325_s27, [#allocation3] }
   0x4   :  { %20 = dma.vmem_to_smem %s18_s26, 16, %s1326_s28, [#allocation3] }
   0x5   :  { %1303 = dma.done.wait [#allocation3], 32 }
   0x6   :  { %1304 = vsyncadd [#allocation3], 4294967264 }
   0x7   :  { %23 = sfence }
   0x8   :  { %s1369_s29 = smov 0   ;;  %s1371_s30 = smov 0  }
   0x9   :  { %s1373_s7 = smov 0   ;;  %s1375_s0 = smov 0  }
   0xa   :  { %s1377_s8 = smov 0  }
   0xb LB: > { %s38_s1 = sadd.s32 1, %s1315_s7  ;;  %s41_s9 = sadd.s32 1, %s1319_s0  ;;  %s1323_s8 = sphi %s1377_s8, %s29_s8   ;;  %s1319_s0 = sphi %s1375_s0, %s1722_s0   ;;  %s1315_s7 = sphi %s1373_s7, %s1721_s7   ;;  %s1311_s30 = sphi %s1371_s30, %s1720_s30   ;;  %s1307_s29 = sphi %s1369_s29, %s1719_s29  }
   0xc   : > { %p39_p0 = scmp.ge.s32.totalorder %s38_s1, 2  ;;  %p1052_p1 = scmp.ge.s32.totalorder %s1323_s8, 1 }
   0xd   : > { %p239_p2 = scmp.lt.s32.totalorder %s1323_s8, 11 }
   0xe   : > { %s1724_s1 = smov (%p39_p0, %s38_s1), 0  ;;  %s1726_s9 = smov (!%p39_p0, %s41_s9), %s1319_s0 }
   0xf   : > { %p240_p3 = pnand %p1052_p1, %p239_p2  ;;  %p43_p4 = scmp.ge.s32.totalorder %s1726_s9, 5 }
  0x10   : > { %s1053_s10 = sshll.u32 (!%p240_p3), %s1311_s30, 5  ;;  %s294_s11 = sld [smem:[#allocation4 + %s1311_s30]] (!%p240_p3) }
  0x11   : > { %s1728_s9 = smov (%p43_p4, %s1726_s9), 0  ;;  %243 = sbr.rel (%p240_p3) target bundleno = 544 (0x220), region = 36 }
  0x12   : > { %p289_p5 = scmp.lt.s32.totalorder (!%p240_p3), %s1053_s10, 159  ;;  %p297_p6 = scmp.lt.s32.totalorder (!%p240_p3), %s1307_s29, 1 }
  0x13   : > { %s305_s12 = sld [smem:[#allocation4 + %s1311_s30]] (!%p240_p3) }
  0x14   : > { %s1717_s2 = sld [smem:[#allocation7_spill]] (!%p240_p3) }
  0x15   : > { %s1718_s5 = sld [smem:[#allocation8_spill]] (!%p240_p3) }
  0x16   : > { %s1730_s10 = smov (!%p289_p5, %s1053_s10), 159  ;;  %p295_p7 = scmp.lt.s32.totalorder %s294_s11, 3 }
  0x17   : > { %s298_s13 = scalar_select %p297_p6, %s1307_s29, 1 }
  0x18   : > { %s1054_s14 = sshll.u32 %s1730_s10, 2  ;;  %s1060_s15 = sshll.u32 %s1730_s10, 3 }
  0x19   : > { %s1055_s19 = sshll.u32 %s298_s13, 4  ;;  %s1732_s11 = smov (!%p295_p7, %s294_s11), 3 }
  0x1a   : > { %s1411_s18 = scalar_lea.vmem %s1717_s2, %s1054_s14  ;;  %p306_p8 = scmp.lt.s32.totalorder %s305_s12, 3 }
  0x1b   : > { %s1416_s22 = scalar_lea.vmem %s1718_s5, %s1060_s15  ;;  %s1421_s25 = scalar_lea.vmem %s1713_s6, %s1060_s15 }
  0x1c   : > { %s1056_s26 = sshll.u32 %s1732_s11, 5  ;;  %s326_s27 = sld [smem:[#allocation5 + %s1311_s30]] }
  0x1d   : > { %s301_s28 = sadd.s32 %s1056_s26, %s1055_s19  ;;  %s1734_s12 = smov (!%p306_p8, %s305_s12), 3 }
  0x1e   : > { %s1057_s10 = sshll.u32 %s301_s28, 2  ;;  %s1058_s20 = sshll.u32 %s1734_s12, 1 }
  0x1f   : > { %s1427_s17 = scalar_lea.vmem %s1710_s3, %s1057_s10  ;;  %s1429_s21 = sadd.s32 %s1058_s20, %s298_s13 }
  0x20   : > { %s312_s23 = scalar_lea.vmem %s1711_s4, %s1429_s21 }
  0x22   : > { %p1063_p9 = scmp.le.s32.totalorder %s326_s27, 0 }
  0x23   : > { %p1064_p10 = scmp.ne.s32.totalorder (!%p1063_p9), %s1307_s29, 0 }
  0x24   : > { %330 = sbr.rel (%p1063_p9) target bundleno = 544 (0x220), region = 40 }
  0x29   : > { %334 = sbr.rel (%p1064_p10) target bundleno = 81 (0x51), region = 44 }
  0x2e   : > { %v1110_v0 = vld [vmem:[%s1411_s18] sm:$0xff]   ;;  %v1173_v1 = vld [vmem:[%s1411_s18 + $0x8] sm:$0xff]   ;;  %v1174_v2 = vld [vmem:[%s1411_s18 + $0x10] sm:$0xff]  }
  0x2f   : > { %v1111_v3 = vunpack.c.l.bf16 %v1110_v0  ;;  %v1112_v4 = vunpack.c.h.bf16 %v1110_v0  ;;  %v1115_v5 = vunpack.c.l.bf16 %v1173_v1  ;;  %v1116_v6 = vunpack.c.h.bf16 %v1173_v1  ;;  %v1175_v7 = vld [vmem:[%s1411_s18 + $0x18] sm:$0xff]   ;;  %v1176_v10 = vld [vmem:[%s1411_s18 + $0x20] sm:$0xff]   ;;  %v1177_v13 = vld [vmem:[%s1411_s18 + $0x28] sm:$0xff]  }
  0x30   : > { %v1119_v8 = vunpack.c.l.bf16 %v1174_v2  ;;  %v1120_v9 = vunpack.c.h.bf16 %v1174_v2  ;;  %v1123_v11 = vunpack.c.l.bf16 %v1175_v7  ;;  %v1124_v12 = vunpack.c.h.bf16 %v1175_v7  ;;  %v1178_v16 = vld [vmem:[%s1411_s18 + $0x30] sm:$0xff]   ;;  %v1179_v19 = vld [vmem:[%s1411_s18 + $0x38] sm:$0xff]   ;;  %v1180_v22 = vld [vmem:[%s1411_s18 + $0x40] sm:$0xff]  }
  0x31   : > { %399 = vst [vmem:[#allocation2 + $0xb0] sm:$0xff] %v1111_v3  ;;  %v1127_v14 = vunpack.c.l.bf16 %v1176_v10  ;;  %v1128_v15 = vunpack.c.h.bf16 %v1176_v10  ;;  %v1131_v17 = vunpack.c.l.bf16 %v1177_v13  ;;  %v1132_v18 = vunpack.c.h.bf16 %v1177_v13  ;;  %v1181_v25 = vld [vmem:[%s1411_s18 + $0x48] sm:$0xff]   ;;  %v1182_v28 = vld [vmem:[%s1411_s18 + $0x50] sm:$0xff]   ;;  %v1183_v31 = vld [vmem:[%s1411_s18 + $0x58] sm:$0xff]  }
  0x32   : > { %400 = vst [vmem:[#allocation2] sm:$0xff] %v1112_v4  ;;  %v1135_v20 = vunpack.c.l.bf16 %v1178_v16  ;;  %v1136_v21 = vunpack.c.h.bf16 %v1178_v16  ;;  %v1139_v23 = vunpack.c.l.bf16 %v1179_v19  ;;  %v1140_v24 = vunpack.c.h.bf16 %v1179_v19  ;;  %v1184_v34 = vld [vmem:[%s1411_s18 + $0x60] sm:$0xff]   ;;  %v1185_v37 = vld [vmem:[%s1411_s18 + $0x68] sm:$0xff]   ;;  %v1186_v40 = vld [vmem:[%s1411_s18 + $0x70] sm:$0xff]  }
  0x33   : > { %401 = vst [vmem:[#allocation2 + $0xd8] sm:$0xff] %v1115_v5  ;;  %v1143_v26 = vunpack.c.l.bf16 %v1180_v22  ;;  %v1144_v27 = vunpack.c.h.bf16 %v1180_v22  ;;  %v1147_v29 = vunpack.c.l.bf16 %v1181_v25  ;;  %v1148_v30 = vunpack.c.h.bf16 %v1181_v25  ;;  %v1187_v43 = vld [vmem:[%s1411_s18 + $0x78] sm:$0xff]  }
  0x34   : > { %402 = vst [vmem:[#allocation2 + $0x18] sm:$0xff] %v1116_v6  ;;  %v1151_v32 = vunpack.c.l.bf16 %v1182_v28  ;;  %v1152_v33 = vunpack.c.h.bf16 %v1182_v28  ;;  %v1155_v35 = vunpack.c.l.bf16 %v1183_v31  ;;  %v1156_v36 = vunpack.c.h.bf16 %v1183_v31 }
  0x35   : > { %403 = vst [vmem:[#allocation2 + $0x50] sm:$0xff] %v1119_v8  ;;  %v1159_v38 = vunpack.c.l.bf16 %v1184_v34  ;;  %v1160_v39 = vunpack.c.h.bf16 %v1184_v34  ;;  %v1163_v41 = vunpack.c.l.bf16 %v1185_v37  ;;  %v1164_v42 = vunpack.c.h.bf16 %v1185_v37 }
  0x36   : > { %404 = vst [vmem:[#allocation2 + $0x68] sm:$0xff] %v1120_v9  ;;  %v1167_v44 = vunpack.c.l.bf16 %v1186_v40  ;;  %v1168_v45 = vunpack.c.h.bf16 %v1186_v40  ;;  %v1171_v46 = vunpack.c.l.bf16 %v1187_v43  ;;  %v1172_v47 = vunpack.c.h.bf16 %v1187_v43 }
  0x37   : > { %405 = vst [vmem:[#allocation2 + $0x30] sm:$0xff] %v1123_v11 }
  0x38   : > { %406 = vst [vmem:[#allocation2 + $0x48] sm:$0xff] %v1124_v12 }
  0x39   : > { %407 = vst [vmem:[#allocation2 + $0x80] sm:$0xff] %v1127_v14 }
  0x3a   : > { %408 = vst [vmem:[#allocation2 + $0x88] sm:$0xff] %v1128_v15 }
  0x3b   : > { %409 = vst [vmem:[#allocation2 + $0xe8] sm:$0xff] %v1131_v17 }
  0x3c   : > { %410 = vst [vmem:[#allocation2 + $0xb8] sm:$0xff] %v1132_v18 }
  0x3d   : > { %411 = vst [vmem:[#allocation2 + $0x60] sm:$0xff] %v1135_v20 }
  0x3e   : > { %412 = vst [vmem:[#allocation2 + $0xf0] sm:$0xff] %v1136_v21 }
  0x3f   : > { %413 = vst [vmem:[#allocation2 + $0x8] sm:$0xff] %v1139_v23 }
  0x40   : > { %414 = vst [vmem:[#allocation2 + $0x78] sm:$0xff] %v1140_v24 }
  0x41   : > { %415 = vst [vmem:[#allocation2 + $0x38] sm:$0xff] %v1143_v26 }
  0x42   : > { %416 = vst [vmem:[#allocation2 + $0x58] sm:$0xff] %v1144_v27 }
  0x43   : > { %417 = vst [vmem:[#allocation2 + $0x40] sm:$0xff] %v1147_v29 }
  0x44   : > { %418 = vst [vmem:[#allocation2 + $0xc8] sm:$0xff] %v1148_v30 }
  0x45   : > { %419 = vst [vmem:[#allocation2 + $0xe0] sm:$0xff] %v1151_v32 }
  0x46   : > { %420 = vst [vmem:[#allocation2 + $0x90] sm:$0xff] %v1152_v33 }
  0x47   : > { %421 = vst [vmem:[#allocation2 + $0x70] sm:$0xff] %v1155_v35 }
  0x48   : > { %422 = vst [vmem:[#allocation2 + $0xc0] sm:$0xff] %v1156_v36 }
  0x49   : > { %423 = vst [vmem:[#allocation2 + $0xa8] sm:$0xff] %v1159_v38 }
  0x4a   : > { %424 = vst [vmem:[#allocation2 + $0xd0] sm:$0xff] %v1160_v39 }
  0x4b   : > { %425 = vst [vmem:[#allocation2 + $0x10] sm:$0xff] %v1163_v41 }
  0x4c   : > { %426 = vst [vmem:[#allocation2 + $0x28] sm:$0xff] %v1164_v42 }
  0x4d   : > { %427 = vst [vmem:[#allocation2 + $0xa0] sm:$0xff] %v1167_v44 }
  0x4e   : > { %428 = vst [vmem:[#allocation2 + $0xf8] sm:$0xff] %v1168_v45 }
  0x4f   : > { %429 = vst [vmem:[#allocation2 + $0x20] sm:$0xff] %v1171_v46 }
  0x50   : > { %430 = vst [vmem:[#allocation2 + $0x98] sm:$0xff] %v1172_v47 }
  0x51 PF: > { %v1108_v48 = vld [vmem:[%s1427_s17 + $0x38] sm:$0xff]  ;;  %v1107_v49 = vld [vmem:[%s1427_s17 + $0x30] sm:$0xff]  ;;  %v1106_v50 = vld [vmem:[%s1427_s17 + $0x28] sm:$0xff]  ;;  %p1097_p11 = scmp.ge.s32.totalorder %s1307_s29, 1 }
  0x52   : > { %547 = vmatpush.bf16.msra.mxu0 %v1108_v48  ;;  %1188 = vmatpush.bf16.msra.mxu1 %v1108_v48  ;;  %v1105_v51 = vld [vmem:[%s1427_s17 + $0x20] sm:$0xff]  ;;  %v1104_v52 = vld [vmem:[%s1427_s17 + $0x18] sm:$0xff]  ;;  %v1103_v53 = vld [vmem:[%s1427_s17 + $0x10] sm:$0xff] }
  0x53   : > { %1189 = vmatpush.bf16.msra.mxu2 %v1108_v48  ;;  %1190 = vmatpush.bf16.msra.mxu3 %v1108_v48  ;;  %v1102_v54 = vld [vmem:[%s1427_s17 + $0x8] sm:$0xff]  ;;  %v1101_v55 = vld [vmem:[%s1427_s17] sm:$0xff]  ;;  %v431_v56 = vld [vmem:[#allocation2 + $0xb0] sm:$0xff] }
  0x54   : > { %v432_v57 = vld [vmem:[#allocation2] sm:$0xff]  ;;  %v440_v59 = vld [vmem:[#allocation2 + $0x88] sm:$0xff]  ;;  %v447_v60 = vld [vmem:[#allocation2 + $0x38] sm:$0xff] }
  0x55   : > { %v439_v58 = vld [vmem:[#allocation2 + $0x80] sm:$0xff]  ;;  %v448_v61 = vld [vmem:[#allocation2 + $0x58] sm:$0xff]  ;;  %v455_v62 = vld [vmem:[#allocation2 + $0xa8] sm:$0xff]  ;;  %v463_v0 = vpack.c.bf16 %v432_v57, %v431_v56 }
  0x56   : > { %548 = vmatpush.bf16.msra.mxu0 %v1107_v49  ;;  %1191 = vmatpush.bf16.msra.mxu1 %v1107_v49  ;;  %v456_v63 = vld [vmem:[#allocation2 + $0xd0] sm:$0xff]  ;;  %v467_v1 = vpack.c.bf16 %v440_v59, %v439_v58  ;;  %v471_v2 = vpack.c.bf16 %v448_v61, %v447_v60  ;;  %v433_v4 = vld [vmem:[#allocation2 + $0xd8] sm:$0xff]  ;;  %v441_v6 = vld [vmem:[#allocation2 + $0xe8] sm:$0xff] }
  0x57   : > { %1192 = vmatpush.bf16.msra.mxu2 %v1107_v49  ;;  %1193 = vmatpush.bf16.msra.mxu3 %v1107_v49  ;;  %v475_v3 = vpack.c.bf16 %v456_v63, %v455_v62  ;;  %v434_v5 = vld [vmem:[#allocation2 + $0x18] sm:$0xff]  ;;  %v449_v8 = vld [vmem:[#allocation2 + $0x40] sm:$0xff]  ;;  %v450_v9 = vld [vmem:[#allocation2 + $0xc8] sm:$0xff] }
  0x58   : > { %v442_v7 = vld [vmem:[#allocation2 + $0xb8] sm:$0xff]  ;;  %v457_v10 = vld [vmem:[#allocation2 + $0x10] sm:$0xff]  ;;  %v458_v11 = vld [vmem:[#allocation2 + $0x28] sm:$0xff]  ;;  %v464_v12 = vpack.c.bf16 %v434_v5, %v433_v4  ;;  %v472_v14 = vpack.c.bf16 %v450_v9, %v449_v8 }
  0x59   : > { %v468_v13 = vpack.c.bf16 %v442_v7, %v441_v6  ;;  %v476_v15 = vpack.c.bf16 %v458_v11, %v457_v10  ;;  %v435_v16 = vld [vmem:[#allocation2 + $0x50] sm:$0xff]  ;;  %v436_v17 = vld [vmem:[#allocation2 + $0x68] sm:$0xff]  ;;  %v443_v18 = vld [vmem:[#allocation2 + $0x60] sm:$0xff] }
  0x5a   : > { %549 = vmatpush.bf16.msra.mxu0 %v1106_v50  ;;  %1194 = vmatpush.bf16.msra.mxu1 %v1106_v50  ;;  %v444_v19 = vld [vmem:[#allocation2 + $0xf0] sm:$0xff]  ;;  %v451_v20 = vld [vmem:[#allocation2 + $0xe0] sm:$0xff]  ;;  %v460_v23 = vld [vmem:[#allocation2 + $0xf8] sm:$0xff]  ;;  %v465_v24 = vpack.c.bf16 %v436_v17, %v435_v16 }
  0x5b   : > { %1195 = vmatpush.bf16.msra.mxu2 %v1106_v50  ;;  %1196 = vmatpush.bf16.msra.mxu3 %v1106_v50  ;;  %v452_v21 = vld [vmem:[#allocation2 + $0x90] sm:$0xff]  ;;  %v459_v22 = vld [vmem:[#allocation2 + $0xa0] sm:$0xff]  ;;  %v469_v25 = vpack.c.bf16 %v444_v19, %v443_v18  ;;  %v438_v29 = vld [vmem:[#allocation2 + $0x48] sm:$0xff] }
  0x5c   : > { %v473_v26 = vpack.c.bf16 %v452_v21, %v451_v20  ;;  %v477_v27 = vpack.c.bf16 %v460_v23, %v459_v22  ;;  %v437_v28 = vld [vmem:[#allocation2 + $0x30] sm:$0xff]  ;;  %v445_v30 = vld [vmem:[#allocation2 + $0x8] sm:$0xff]  ;;  %v446_v31 = vld [vmem:[#allocation2 + $0x78] sm:$0xff] }
  0x5d   : > { %v453_v32 = vld [vmem:[#allocation2 + $0x70] sm:$0xff]  ;;  %v454_v33 = vld [vmem:[#allocation2 + $0xc0] sm:$0xff]  ;;  %v462_v35 = vld [vmem:[#allocation2 + $0x98] sm:$0xff]  ;;  %v466_v36 = vpack.c.bf16 %v438_v29, %v437_v28  ;;  %v470_v37 = vpack.c.bf16 %v446_v31, %v445_v30 }
  0x5e   : > { %550 = vmatpush.bf16.msra.mxu0 %v1105_v51  ;;  %1197 = vmatpush.bf16.msra.mxu1 %v1105_v51  ;;  %v461_v34 = vld [vmem:[#allocation2 + $0x20] sm:$0xff]  ;;  %v474_v38 = vpack.c.bf16 %v454_v33, %v453_v32 }
  0x5f   : > { %1198 = vmatpush.bf16.msra.mxu2 %v1105_v51  ;;  %1199 = vmatpush.bf16.msra.mxu3 %v1105_v51  ;;  %v478_v39 = vpack.c.bf16 %v462_v35, %v461_v34  ;;  %v1465_v40 = vld [vmem:[%s312_s23] ss:$0 sm:$0xff] }
  0x62   : > { %551 = vmatpush.bf16.msra.mxu0 %v1104_v52  ;;  %1200 = vmatpush.bf16.msra.mxu1 %v1104_v52 }
  0x63   : > { %1201 = vmatpush.bf16.msra.mxu2 %v1104_v52  ;;  %1202 = vmatpush.bf16.msra.mxu3 %v1104_v52 }
  0x66   : > { %552 = vmatpush.bf16.msra.mxu0 %v1103_v53  ;;  %1203 = vmatpush.bf16.msra.mxu1 %v1103_v53 }
  0x67   : > { %1204 = vmatpush.bf16.msra.mxu2 %v1103_v53  ;;  %1205 = vmatpush.bf16.msra.mxu3 %v1103_v53 }
  0x6a   : > { %553 = vmatpush.bf16.msra.mxu0 %v1102_v54  ;;  %1206 = vmatpush.bf16.msra.mxu1 %v1102_v54 }
  0x6b   : > { %1207 = vmatpush.bf16.msra.mxu2 %v1102_v54  ;;  %1208 = vmatpush.bf16.msra.mxu3 %v1102_v54 }
  0x6e   : > { %554 = vmatpush.bf16.msra.mxu0 %v1101_v55  ;;  %1209 = vmatpush.bf16.msra.mxu1 %v1101_v55 }
  0x6f   : > { %1210 = vmatpush.bf16.msra.mxu2 %v1101_v55  ;;  %1211 = vmatpush.bf16.msra.mxu3 %v1101_v55 }
  0x71   : > { %555 = vmatmul.bf16.vlgmr.msra.gmra.mxu0 %v463_v0  ;;  %575 = vmatmul.bf16.vlgmr.msra.gmra.mxu1 %v467_v1 }
  0x72   : > { %595 = vmatmul.bf16.vlgmr.msra.gmra.mxu2 %v471_v2  ;;  %615 = vmatmul.bf16.vlgmr.msra.gmra.mxu3 %v475_v3 }
  0x81   : > { %560 = vmatmul.bf16.gmra.mxu0 %v464_v12  ;;  %580 = vmatmul.bf16.gmra.mxu1 %v468_v13 }
  0x82   : > { %600 = vmatmul.bf16.gmra.mxu2 %v472_v14  ;;  %620 = vmatmul.bf16.gmra.mxu3 %v476_v15 }
  0x91   : > { %565 = vmatmul.bf16.gmra.mxu0 %v465_v24  ;;  %585 = vmatmul.bf16.gmra.mxu1 %v469_v25 }
  0x92   : > { %605 = vmatmul.bf16.gmra.mxu2 %v473_v26  ;;  %625 = vmatmul.bf16.gmra.mxu3 %v477_v27 }
  0xa1   : > { %570 = vmatmul.bf16.gmra.mxu0 %v466_v36  ;;  %590 = vmatmul.bf16.gmra.mxu1 %v470_v37 }
  0xa2   : > { %610 = vmatmul.bf16.gmra.mxu2 %v474_v38  ;;  %630 = vmatmul.bf16.gmra.mxu3 %v478_v39 }
  0xee   : > { %v556_v41 = vpop.f32.mrf.mxu0  ;;  %v576_v42 = vpop.f32.mrf.mxu1 }
  0xef   : > { %v1468_v43 = vadd.f32 %v1465_v40, %v556_v41  ;;  %v1471_v44 = vadd.f32 %v1465_v40, %v576_v42 }
  0xf5   : > { %v596_v45 = vpop.f32.mrf.mxu2  ;;  %v616_v46 = vpop.f32.mrf.mxu3 }
  0xf6   : > { %v1474_v47 = vadd.f32 %v1465_v40, %v596_v45  ;;  %v1477_v48 = vadd.f32 %v1465_v40, %v616_v46  ;;  %v558_v49 = vpop.f32.mrf.mxu0  ;;  %v578_v50 = vpop.f32.mrf.mxu1 }
  0xf7   : > { %v1480_v51 = vadd.f32 %v1465_v40, %v558_v49  ;;  %v1483_v52 = vadd.f32 %v1465_v40, %v578_v50 }
  0xfd   : > { %v598_v53 = vpop.f32.mrf.mxu2  ;;  %v618_v54 = vpop.f32.mrf.mxu3 }
  0xfe   : > { %v1486_v55 = vadd.f32 %v1465_v40, %v598_v53  ;;  %v1489_v56 = vadd.f32 %v1465_v40, %v618_v54  ;;  %v561_v57 = vpop.f32.mrf.mxu0  ;;  %v581_v58 = vpop.f32.mrf.mxu1 }
  0xff   : > { %v1492_v59 = vadd.f32 %v1465_v40, %v561_v57  ;;  %v1495_v60 = vadd.f32 %v1465_v40, %v581_v58 }
 0x105   : > { %v601_v61 = vpop.f32.mrf.mxu2  ;;  %v621_v62 = vpop.f32.mrf.mxu3 }
 0x106   : > { %v1498_v63 = vadd.f32 %v1465_v40, %v601_v61  ;;  %v1501_v0 = vadd.f32 %v1465_v40, %v621_v62  ;;  %v563_v1 = vpop.f32.mrf.mxu0  ;;  %v583_v2 = vpop.f32.mrf.mxu1 }
 0x107   : > { %v1504_v3 = vadd.f32 %v1465_v40, %v563_v1  ;;  %v1507_v4 = vadd.f32 %v1465_v40, %v583_v2 }
 0x10d   : > { %v603_v5 = vpop.f32.mrf.mxu2  ;;  %v623_v6 = vpop.f32.mrf.mxu3 }
 0x10e   : > { %v1510_v7 = vadd.f32 %v1465_v40, %v603_v5  ;;  %v1513_v8 = vadd.f32 %v1465_v40, %v623_v6  ;;  %v566_v9 = vpop.f32.mrf.mxu0  ;;  %v586_v10 = vpop.f32.mrf.mxu1 }
 0x10f   : > { %v1516_v11 = vadd.f32 %v1465_v40, %v566_v9  ;;  %v1519_v12 = vadd.f32 %v1465_v40, %v586_v10 }
 0x115   : > { %v606_v13 = vpop.f32.mrf.mxu2  ;;  %v626_v14 = vpop.f32.mrf.mxu3 }
 0x116   : > { %v1522_v15 = vadd.f32 %v1465_v40, %v606_v13  ;;  %v1525_v16 = vadd.f32 %v1465_v40, %v626_v14  ;;  %v568_v17 = vpop.f32.mrf.mxu0  ;;  %v588_v18 = vpop.f32.mrf.mxu1 }
 0x117   : > { %v1528_v19 = vadd.f32 %v1465_v40, %v568_v17  ;;  %v1531_v20 = vadd.f32 %v1465_v40, %v588_v18 }
 0x11d   : > { %v608_v21 = vpop.f32.mrf.mxu2  ;;  %v628_v22 = vpop.f32.mrf.mxu3 }
 0x11e   : > { %v1534_v23 = vadd.f32 %v1465_v40, %v608_v21  ;;  %v1537_v24 = vadd.f32 %v1465_v40, %v628_v22  ;;  %v571_v25 = vpop.f32.mrf.mxu0  ;;  %v591_v26 = vpop.f32.mrf.mxu1 }
 0x11f   : > { %v1540_v27 = vadd.f32 %v1465_v40, %v571_v25  ;;  %v1543_v28 = vadd.f32 %v1465_v40, %v591_v26 }
 0x125   : > { %v611_v29 = vpop.f32.mrf.mxu2  ;;  %v631_v30 = vpop.f32.mrf.mxu3 }
 0x126   : > { %v1546_v31 = vadd.f32 %v1465_v40, %v611_v29  ;;  %v1549_v32 = vadd.f32 %v1465_v40, %v631_v30  ;;  %v573_v33 = vpop.f32.mrf.mxu0  ;;  %v593_v34 = vpop.f32.mrf.mxu1 }
 0x127   : > { %v1552_v35 = vadd.f32 %v1465_v40, %v573_v33  ;;  %v1555_v36 = vadd.f32 %v1465_v40, %v593_v34 }
 0x12a   : > { %639 = sbr.rel (%p1097_p11) target bundleno = 335 (0x14f), region = 48 }
 0x12d   : > { %v613_v37 = vpop.f32.mrf.mxu2  ;;  %v633_v38 = vpop.f32.mrf.mxu3 }
 0x12e   : > { %v1558_v39 = vadd.f32 %v1465_v40, %v613_v37  ;;  %v1561_v41 = vadd.f32 %v1465_v40, %v633_v38 }
 0x12f   : > { %640 = vst [vmem:[#allocation2 + $0xb0] sm:$0xff] %v1468_v43 }
 0x130   : > { %641 = vst [vmem:[#allocation2] sm:$0xff] %v1480_v51 }
 0x131   : > { %642 = vst [vmem:[#allocation2 + $0xd8] sm:$0xff] %v1492_v59 }
 0x132   : > { %643 = vst [vmem:[#allocation2 + $0x18] sm:$0xff] %v1504_v3 }
 0x133   : > { %644 = vst [vmem:[#allocation2 + $0x50] sm:$0xff] %v1516_v11 }
 0x134   : > { %645 = vst [vmem:[#allocation2 + $0x68] sm:$0xff] %v1528_v19 }
 0x135   : > { %646 = vst [vmem:[#allocation2 + $0x30] sm:$0xff] %v1540_v27 }
 0x136   : > { %647 = vst [vmem:[#allocation2 + $0x48] sm:$0xff] %v1552_v35 }
 0x137   : > { %648 = vst [vmem:[#allocation2 + $0x80] sm:$0xff] %v1471_v44 }
 0x138   : > { %649 = vst [vmem:[#allocation2 + $0x88] sm:$0xff] %v1483_v52 }
 0x139   : > { %650 = vst [vmem:[#allocation2 + $0xe8] sm:$0xff] %v1495_v60 }
 0x13a   : > { %651 = vst [vmem:[#allocation2 + $0xb8] sm:$0xff] %v1507_v4 }
 0x13b   : > { %652 = vst [vmem:[#allocation2 + $0x60] sm:$0xff] %v1519_v12 }
 0x13c   : > { %653 = vst [vmem:[#allocation2 + $0xf0] sm:$0xff] %v1531_v20 }
 0x13d   : > { %654 = vst [vmem:[#allocation2 + $0x8] sm:$0xff] %v1543_v28 }
 0x13e   : > { %655 = vst [vmem:[#allocation2 + $0x78] sm:$0xff] %v1555_v36 }
 0x13f   : > { %656 = vst [vmem:[#allocation2 + $0x38] sm:$0xff] %v1474_v47 }
 0x140   : > { %657 = vst [vmem:[#allocation2 + $0x58] sm:$0xff] %v1486_v55 }
 0x141   : > { %658 = vst [vmem:[#allocation2 + $0x40] sm:$0xff] %v1498_v63 }
 0x142   : > { %659 = vst [vmem:[#allocation2 + $0xc8] sm:$0xff] %v1510_v7 }
 0x143   : > { %660 = vst [vmem:[#allocation2 + $0xe0] sm:$0xff] %v1522_v15 }
 0x144   : > { %661 = vst [vmem:[#allocation2 + $0x90] sm:$0xff] %v1534_v23 }
 0x145   : > { %662 = vst [vmem:[#allocation2 + $0x70] sm:$0xff] %v1546_v31 }
 0x146   : > { %663 = vst [vmem:[#allocation2 + $0xc0] sm:$0xff] %v1558_v39 }
 0x147   : > { %664 = vst [vmem:[#allocation2 + $0xa8] sm:$0xff] %v1477_v48 }
 0x148   : > { %665 = vst [vmem:[#allocation2 + $0xd0] sm:$0xff] %v1489_v56 }
 0x149   : > { %666 = vst [vmem:[#allocation2 + $0x10] sm:$0xff] %v1501_v0 }
 0x14a   : > { %667 = vst [vmem:[#allocation2 + $0x28] sm:$0xff] %v1513_v8 }
 0x14b   : > { %668 = vst [vmem:[#allocation2 + $0xa0] sm:$0xff] %v1525_v16 }
 0x14c   : > { %669 = vst [vmem:[#allocation2 + $0xf8] sm:$0xff] %v1537_v24 }
 0x14d   : > { %670 = vst [vmem:[#allocation2 + $0x20] sm:$0xff] %v1549_v32 }
 0x14e   : > { %671 = vst [vmem:[#allocation2 + $0x98] sm:$0xff] %v1561_v41 }
 0x14f PF: > { %p1098_p12 = scmp.ne.s32.totalorder %s1307_s29, 1 }
 0x151   : > { %675 = sbr.rel (%p1098_p12) target bundleno = 544 (0x220), region = 52 }
 0x156   : > { %v680_v40 = vld [vmem:[%s1416_s22 + $0x20] sm:$0xff]  ;;  %v678_v42 = vld [vmem:[%s1416_s22 + $0x10] sm:$0xff]  ;;  %v1327_v46 = vmov 0   ;;  %v681_v49 = vld [vmem:[%s1416_s22 + $0x28] sm:$0xff] }
 0x157   : > { %v676_v45 = vld [vmem:[%s1416_s22] sm:$0xff]  ;;  %1258 = vset.pattern.permute.xlu2 %v1327_v46  ;;  %1257 = vset.pattern.permute.xlu1 %v1327_v46  ;;  %v679_v50 = vld [vmem:[%s1416_s22 + $0x18] sm:$0xff]  ;;  %v677_v53 = vld [vmem:[%s1416_s22 + $0x8] sm:$0xff] }
 0x158   : > { %1256 = vset.pattern.permute.xlu0 %v1327_v46  ;;  %730 = vperm.xlu2 %1258, %v680_v40   ;;  %v684_v54 = vld [vmem:[%s1416_s22 + $0x40] sm:$0xff]  ;;  %v683_v57 = vld [vmem:[%s1416_s22 + $0x38] sm:$0xff]  ;;  %v682_v58 = vld [vmem:[%s1416_s22 + $0x30] sm:$0xff] }
 0x159   : > { %720 = vperm.xlu1 %1257, %v678_v42   ;;  %710 = vperm.xlu0 %1256, %v676_v45   ;;  %v687_v61 = vld [vmem:[%s1416_s22 + $0x58] sm:$0xff]  ;;  %v686_v62 = vld [vmem:[%s1416_s22 + $0x50] sm:$0xff]  ;;  %v685_v1 = vld [vmem:[%s1416_s22 + $0x48] sm:$0xff] }
 0x15a   : > { %v690_v2 = vld [vmem:[%s1416_s22 + $0x70] sm:$0xff]  ;;  %v689_v5 = vld [vmem:[%s1416_s22 + $0x68] sm:$0xff]  ;;  %v688_v6 = vld [vmem:[%s1416_s22 + $0x60] sm:$0xff] }
 0x15b   : > { %v693_v9 = vld [vmem:[%s1416_s22 + $0x88] sm:$0xff]  ;;  %v692_v10 = vld [vmem:[%s1416_s22 + $0x80] sm:$0xff]  ;;  %v691_v13 = vld [vmem:[%s1416_s22 + $0x78] sm:$0xff] }
 0x15c   : > { %v696_v14 = vld [vmem:[%s1416_s22 + $0xa0] sm:$0xff]  ;;  %v695_v17 = vld [vmem:[%s1416_s22 + $0x98] sm:$0xff]  ;;  %v694_v18 = vld [vmem:[%s1416_s22 + $0x90] sm:$0xff] }
 0x15d   : > { %v699_v21 = vld [vmem:[%s1416_s22 + $0xb8] sm:$0xff]  ;;  %v698_v22 = vld [vmem:[%s1416_s22 + $0xb0] sm:$0xff]  ;;  %v697_v25 = vld [vmem:[%s1416_s22 + $0xa8] sm:$0xff] }
 0x15e   : > { %v702_v26 = vld [vmem:[%s1416_s22 + $0xd0] sm:$0xff]  ;;  %v701_v29 = vld [vmem:[%s1416_s22 + $0xc8] sm:$0xff]  ;;  %v700_v30 = vld [vmem:[%s1416_s22 + $0xc0] sm:$0xff] }
 0x15f   : > { %v705_v33 = vld [vmem:[%s1416_s22 + $0xe8] sm:$0xff]  ;;  %v704_v34 = vld [vmem:[%s1416_s22 + $0xe0] sm:$0xff]  ;;  %v703_v37 = vld [vmem:[%s1416_s22 + $0xd8] sm:$0xff] }
 0x160   : > { %735 = vperm.xlu2 %1258, %v681_v49   ;;  %v707_v38 = vld [vmem:[%s1416_s22 + $0xf8] sm:$0xff]  ;;  %v706_v40 = vld [vmem:[%s1416_s22 + $0xf0] sm:$0xff] }
 0x161   : > { %725 = vperm.xlu1 %1257, %v679_v50   ;;  %715 = vperm.xlu0 %1256, %v677_v53  }
 0x168   : > { %750 = vperm.xlu2 %1258, %v684_v54  }
 0x169   : > { %745 = vperm.xlu1 %1257, %v683_v57   ;;  %740 = vperm.xlu0 %1256, %v682_v58  }
 0x170   : > { %765 = vperm.xlu2 %1258, %v687_v61  }
 0x171   : > { %760 = vperm.xlu1 %1257, %v686_v62   ;;  %755 = vperm.xlu0 %1256, %v685_v1  }
 0x178   : > { %780 = vperm.xlu2 %1258, %v690_v2  }
 0x179   : > { %775 = vperm.xlu1 %1257, %v689_v5   ;;  %770 = vperm.xlu0 %1256, %v688_v6  }
 0x180   : > { %795 = vperm.xlu2 %1258, %v693_v9  }
 0x181   : > { %790 = vperm.xlu1 %1257, %v692_v10   ;;  %785 = vperm.xlu0 %1256, %v691_v13  }
 0x188   : > { %810 = vperm.xlu2 %1258, %v696_v14  }
 0x189   : > { %805 = vperm.xlu1 %1257, %v695_v17   ;;  %800 = vperm.xlu0 %1256, %v694_v18  }
 0x190   : > { %825 = vperm.xlu2 %1258, %v699_v21  }
 0x191   : > { %820 = vperm.xlu1 %1257, %v698_v22   ;;  %815 = vperm.xlu0 %1256, %v697_v25  }
 0x198   : > { %840 = vperm.xlu2 %1258, %v702_v26  }
 0x199   : > { %835 = vperm.xlu1 %1257, %v701_v29   ;;  %830 = vperm.xlu0 %1256, %v700_v30  }
 0x1a0   : > { %855 = vperm.xlu2 %1258, %v705_v33  }
 0x1a1   : > { %850 = vperm.xlu1 %1257, %v704_v34   ;;  %845 = vperm.xlu0 %1256, %v703_v37  }
 0x1a9   : > { %865 = vperm.xlu1 %1257, %v707_v38   ;;  %860 = vperm.xlu0 %1256, %v706_v40  }
 0x1b2   : > { %v731_v42 = vpop.permute.xlu2 %730 }
 0x1b3   : > { %v872_v45 = vmul.f32 %v731_v42, %v1516_v11 }
 0x1b5   : > { %904 = vst [vmem:[%s1421_s25 + $0x20] sm:$0xff] %v872_v45 }
 0x1ba   : > { %v736_v46 = vpop.permute.xlu2 %735 }
 0x1bb   : > { %v873_v49 = vmul.f32 %v736_v46, %v1528_v19 }
 0x1bd   : > { %905 = vst [vmem:[%s1421_s25 + $0x28] sm:$0xff] %v873_v49 }
 0x1c2   : > { %v751_v50 = vpop.permute.xlu2 %750 }
 0x1c3   : > { %v876_v53 = vmul.f32 %v751_v50, %v1471_v44 }
 0x1c5   : > { %908 = vst [vmem:[%s1421_s25 + $0x40] sm:$0xff] %v876_v53 }
 0x1ca   : > { %v766_v54 = vpop.permute.xlu2 %765 }
 0x1cb   : > { %v879_v57 = vmul.f32 %v766_v54, %v1507_v4  ;;  %v721_v58 = vpop.permute.xlu1 %720  ;;  %v711_v61 = vpop.permute.xlu0 %710 }
 0x1cc   : > { %v870_v11 = vmul.f32 %v721_v58, %v1492_v59  ;;  %v868_v62 = vmul.f32 %v711_v61, %v1468_v43 }
 0x1cd   : > { %911 = vst [vmem:[%s1421_s25 + $0x58] sm:$0xff] %v879_v57 }
 0x1ce   : > { %902 = vst [vmem:[%s1421_s25 + $0x10] sm:$0xff] %v870_v11 }
 0x1cf   : > { %900 = vst [vmem:[%s1421_s25] sm:$0xff] %v868_v62 }
 0x1d2   : > { %v781_v19 = vpop.permute.xlu2 %780 }
 0x1d3   : > { %v882_v44 = vmul.f32 %v781_v19, %v1543_v28  ;;  %v726_v1 = vpop.permute.xlu1 %725  ;;  %v716_v2 = vpop.permute.xlu0 %715 }
 0x1d4   : > { %v871_v4 = vmul.f32 %v726_v1, %v1504_v3  ;;  %v869_v5 = vmul.f32 %v716_v2, %v1480_v51 }
 0x1d5   : > { %914 = vst [vmem:[%s1421_s25 + $0x70] sm:$0xff] %v882_v44 }
 0x1d6   : > { %903 = vst [vmem:[%s1421_s25 + $0x18] sm:$0xff] %v871_v4 }
 0x1d7   : > { %901 = vst [vmem:[%s1421_s25 + $0x8] sm:$0xff] %v869_v5 }
 0x1da   : > { %v796_v43 = vpop.permute.xlu2 %795 }
 0x1db   : > { %v885_v59 = vmul.f32 %v796_v43, %v1486_v55  ;;  %v746_v6 = vpop.permute.xlu1 %745  ;;  %v741_v9 = vpop.permute.xlu0 %740 }
 0x1dc   : > { %v875_v28 = vmul.f32 %v746_v6, %v1552_v35  ;;  %v874_v10 = vmul.f32 %v741_v9, %v1540_v27 }
 0x1dd   : > { %917 = vst [vmem:[%s1421_s25 + $0x88] sm:$0xff] %v885_v59 }
 0x1de   : > { %907 = vst [vmem:[%s1421_s25 + $0x38] sm:$0xff] %v875_v28 }
 0x1df   : > { %906 = vst [vmem:[%s1421_s25 + $0x30] sm:$0xff] %v874_v10 }
 0x1e2   : > { %v811_v51 = vpop.permute.xlu2 %810 }
 0x1e3   : > { %v888_v3 = vmul.f32 %v811_v51, %v1522_v15  ;;  %v761_v13 = vpop.permute.xlu1 %760  ;;  %v756_v14 = vpop.permute.xlu0 %755 }
 0x1e4   : > { %v878_v55 = vmul.f32 %v761_v13, %v1495_v60  ;;  %v877_v17 = vmul.f32 %v756_v14, %v1483_v52 }
 0x1e5   : > { %920 = vst [vmem:[%s1421_s25 + $0xa0] sm:$0xff] %v888_v3 }
 0x1e6   : > { %910 = vst [vmem:[%s1421_s25 + $0x50] sm:$0xff] %v878_v55 }
 0x1e7   : > { %909 = vst [vmem:[%s1421_s25 + $0x48] sm:$0xff] %v877_v17 }
 0x1ea   : > { %v826_v27 = vpop.permute.xlu2 %825 }
 0x1eb   : > { %v891_v35 = vmul.f32 %v826_v27, %v1558_v39  ;;  %v776_v18 = vpop.permute.xlu1 %775  ;;  %v771_v21 = vpop.permute.xlu0 %770 }
 0x1ec   : > { %v881_v15 = vmul.f32 %v776_v18, %v1531_v20  ;;  %v880_v22 = vmul.f32 %v771_v21, %v1519_v12 }
 0x1ed   : > { %923 = vst [vmem:[%s1421_s25 + $0xb8] sm:$0xff] %v891_v35 }
 0x1ee   : > { %913 = vst [vmem:[%s1421_s25 + $0x68] sm:$0xff] %v881_v15 }
 0x1ef   : > { %912 = vst [vmem:[%s1421_s25 + $0x60] sm:$0xff] %v880_v22 }
 0x1f2   : > { %v841_v52 = vpop.permute.xlu2 %840 }
 0x1f3   : > { %v894_v60 = vmul.f32 %v841_v52, %v1501_v0  ;;  %v791_v25 = vpop.permute.xlu1 %790  ;;  %v786_v26 = vpop.permute.xlu0 %785 }
 0x1f4   : > { %v884_v39 = vmul.f32 %v791_v25, %v1474_v47  ;;  %v883_v29 = vmul.f32 %v786_v26, %v1555_v36 }
 0x1f5   : > { %926 = vst [vmem:[%s1421_s25 + $0xd0] sm:$0xff] %v894_v60 }
 0x1f6   : > { %916 = vst [vmem:[%s1421_s25 + $0x80] sm:$0xff] %v884_v39 }
 0x1f7   : > { %915 = vst [vmem:[%s1421_s25 + $0x78] sm:$0xff] %v883_v29 }
 0x1fa   : > { %v856_v12 = vpop.permute.xlu2 %855 }
 0x1fb   : > { %v897_v20 = vmul.f32 %v856_v12, %v1537_v24  ;;  %v806_v30 = vpop.permute.xlu1 %805  ;;  %v801_v33 = vpop.permute.xlu0 %800 }
 0x1fc   : > { %v887_v0 = vmul.f32 %v806_v30, %v1510_v7  ;;  %v886_v34 = vmul.f32 %v801_v33, %v1498_v63 }
 0x1fd   : > { %929 = vst [vmem:[%s1421_s25 + $0xe8] sm:$0xff] %v897_v20 }
 0x1fe   : > { %919 = vst [vmem:[%s1421_s25 + $0x98] sm:$0xff] %v887_v0 }
 0x1ff   : > { %918 = vst [vmem:[%s1421_s25 + $0x90] sm:$0xff] %v886_v34 }
 0x203   : > { %v821_v47 = vpop.permute.xlu1 %820  ;;  %v816_v36 = vpop.permute.xlu0 %815 }
 0x204   : > { %v890_v37 = vmul.f32 %v821_v47, %v1546_v31  ;;  %v889_v38 = vmul.f32 %v816_v36, %v1534_v23 }
 0x206   : > { %922 = vst [vmem:[%s1421_s25 + $0xb0] sm:$0xff] %v890_v37 }
 0x207   : > { %921 = vst [vmem:[%s1421_s25 + $0xa8] sm:$0xff] %v889_v38 }
 0x20b   : > { %v836_v24 = vpop.permute.xlu1 %835  ;;  %v831_v40 = vpop.permute.xlu0 %830 }
 0x20c   : > { %v893_v7 = vmul.f32 %v836_v24, %v1489_v56  ;;  %v892_v63 = vmul.f32 %v831_v40, %v1477_v48 }
 0x20e   : > { %925 = vst [vmem:[%s1421_s25 + $0xc8] sm:$0xff] %v893_v7 }
 0x20f   : > { %924 = vst [vmem:[%s1421_s25 + $0xc0] sm:$0xff] %v892_v63 }
 0x213   : > { %v851_v42 = vpop.permute.xlu1 %850  ;;  %v846_v45 = vpop.permute.xlu0 %845 }
 0x214   : > { %v896_v46 = vmul.f32 %v851_v42, %v1525_v16  ;;  %v895_v31 = vmul.f32 %v846_v45, %v1513_v8 }
 0x216   : > { %928 = vst [vmem:[%s1421_s25 + $0xe0] sm:$0xff] %v896_v46 }
 0x217   : > { %927 = vst [vmem:[%s1421_s25 + $0xd8] sm:$0xff] %v895_v31 }
 0x21b   : > { %v866_v23 = vpop.permute.xlu1 %865  ;;  %v861_v49 = vpop.permute.xlu0 %860 }
 0x21c   : > { %v899_v50 = vmul.f32 %v866_v23, %v1561_v41  ;;  %v898_v53 = vmul.f32 %v861_v49, %v1549_v32 }
 0x21e   : > { %931 = vst [vmem:[%s1421_s25 + $0xf8] sm:$0xff] %v899_v50 }
 0x21f   : > { %930 = vst [vmem:[%s1421_s25 + $0xf0] sm:$0xff] %v898_v53 }
 0x220 PF: > { %s29_s8 = sadd.s32 1, %s1323_s8   ;;  %s1719_s29 = smov %s1315_s7 }
 0x221   : > { %p26_p13 = scmp.ge.s32.totalorder %s29_s8, 12   ;;  %s1720_s30 = smov %s1319_s0 }
 0x222   : > { %s1721_s7 = smov %s1724_s1  ;;  %s1722_s0 = smov %s1728_s9 }
 0x223   :  { %28 = sbr.rel (!%p26_p13) target bundleno = 11 (0xb), region = 91 }

</bundles_post_ra>
